<compile_context>
chip_gen: v7x
topology: tpu7x:2x2x1
jax: 0.10.0
libtpu: 0.0.40
codegen_flags: <defaults>
</compile_context>

<pallas_src>
import numpy as np
import jax
import jax.numpy as jnp
from jax import lax
from jax.experimental import pallas as pl
from jax.experimental.pallas import tpu as pltpu


# ---------------------------------------------------------------------------
# Pallas kernel: whole T_Branch forward for one batch element (grid over N)
# ---------------------------------------------------------------------------
def t_branch_kernel(x_ref, a_ref, a4_ref, asc_ref, b_ref, al_ref, out_ref):
    x = x_ref[0]                      # (H, W*C) lane-dense activation slab
    bias = b_ref[...]                 # (5, W*C)  conv2 bias, tiled over W
    alpha = al_ref[...]               # (5, W*C)  PReLU alpha, tiled over lanes

    def shift_rows(v, s):
        """y[h] = v[h - s] with zero padding (s in {+1, -1}); XLU roll + mask."""
        h = v.shape[0]
        rolled = pltpu.roll(v, s % h, axis=0)
        row = lax.broadcasted_iota(jnp.int32, v.shape, 0)
        edge = 0 if s > 0 else h - 1
        return jnp.where(row == edge, 0.0, rolled)

    def fused_asym(v, A, i):
        """One AsymmetricConvolution (both convs, all taps, zero padding, bias,
        PReLU) as a single MXU matmul against a prepacked (3*Win, Wout) matrix."""
        stacked = jnp.concatenate([shift_rows(v, 1), v, shift_rows(v, -1)], axis=-1)
        c = jnp.dot(stacked, A, preferred_element_type=jnp.float32)
        c = c + bias[i:i + 1]                               # (1, W*C) broadcast
        return jnp.where(c >= 0.0, c, alpha[i:i + 1] * c)   # PReLU

    # Blocks 0..3: in == out channels -> identity shortcut.
    x0 = fused_asym(x,  a_ref[0], 0) + x
    x1 = fused_asym(x0, a_ref[1], 1) + x0
    x2 = fused_asym(x1, a_ref[2], 2) + x1
    x3 = fused_asym(x2, a_ref[3], 3) + x2

    # Block 4: input is the channel concat [x, x0, x1, x2, x3] (20 channels),
    # kept lane-dense as a (H, 5*W*C) slab; shortcut is a 1x1 conv (one matmul).
    cat = jnp.concatenate([x, x0, x1, x2, x3], axis=-1)
    c4 = fused_asym(cat, a4_ref[...], 4)
    sc = jnp.dot(cat, asc_ref[...], preferred_element_type=jnp.float32)
    x4 = c4 + sc

    threshold = jax.nn.sigmoid(x4)
    out_ref[0] = jnp.where(x > threshold, x, 0.0)


# ---------------------------------------------------------------------------
# Wrapper: NCHW <-> lane-dense (N, H, W*C), grid over N ("parallel")
# ---------------------------------------------------------------------------
def t_branch_forward(x_nchw, kern_params):
    N, C, H, W = x_nchw.shape
    WC = W * C
    A, A4, Asc, Bl, Al = kern_params
    x = jnp.transpose(x_nchw, (0, 2, 3, 1)).reshape(N, H, WC).astype(jnp.float32)

    grid_spec = pltpu.PrefetchScalarGridSpec(
        num_scalar_prefetch=0,
        grid=(N,),
        in_specs=[
            pl.BlockSpec((1, H, WC), lambda n: (n, 0, 0)),
            pl.BlockSpec(A.shape,   lambda n: (0, 0, 0)),
            pl.BlockSpec(A4.shape,  lambda n: (0, 0)),
            pl.BlockSpec(Asc.shape, lambda n: (0, 0)),
            pl.BlockSpec(Bl.shape,  lambda n: (0, 0)),
            pl.BlockSpec(Al.shape,  lambda n: (0, 0)),
        ],
        out_specs=pl.BlockSpec((1, H, WC), lambda n: (n, 0, 0)),
    )
    out = pl.pallas_call(
        t_branch_kernel,
        out_shape=jax.ShapeDtypeStruct((N, H, WC), jnp.float32),
        grid_spec=grid_spec,
        compiler_params=pltpu.CompilerParams(
            dimension_semantics=("parallel",),
            vmem_limit_bytes=32 * 1024 * 1024,
        ),
    )(x, A, A4, Asc, Bl, Al)
    return jnp.transpose(out.reshape(N, H, W, C), (0, 3, 1, 2))   # -> NCHW


# ---------------------------------------------------------------------------
# Host-side weight packing: fold both asymmetric convs (all taps + padding)
# of one block into a single (3*W*Cin, W*Cout) matrix acting on the lane axis.
# Lane ordering of activations: [part j][w][c] with c fastest (C = 4).
# ---------------------------------------------------------------------------
def _build_asym_matrix(w1_oihw, w2_oihw, W):
    w1 = np.asarray(w1_oihw, np.float32)            # (Co, Ci, 3, 1), pad (1,0)
    w2 = np.asarray(w2_oihw, np.float32)            # (Co, Ci, 1, 3), pad (0,1)
    Co, Ci = w1.shape[:2]
    win = W * Ci
    A = np.zeros((3 * win, W * Co), np.float32)

    def lane_in(ci, w):
        j, c = divmod(ci, 4)
        return j * W * 4 + w * 4 + c

    for kh in range(3):                              # (3,1) conv: reads row h+kh-1
        for co in range(Co):
            for ci in range(Ci):
                wgt = w1[co, ci, kh, 0]
                for w in range(W):
                    A[kh * win + lane_in(ci, w), w * Co + co] += wgt
    for kw in range(3):                              # (1,3) conv: reads col w+kw-1
        for co in range(Co):
            for ci in range(Ci):
                wgt = w2[co, ci, 0, kw]
                for w in range(W):
                    ws = w + kw - 1
                    if 0 <= ws < W:                  # zero padding baked in
                        A[win + lane_in(ci, ws), w * Co + co] += wgt
    return A


def _build_pointwise_matrix(w_oihw, W):
    w = np.asarray(w_oihw, np.float32)               # (Co, Ci, 1, 1), no bias
    Co, Ci = w.shape[:2]
    A = np.zeros((W * Ci, W * Co), np.float32)
    for co in range(Co):
        for ci in range(Ci):
            j, c = divmod(ci, 4)
            wgt = w[co, ci, 0, 0]
            for x in range(W):
                A[j * W * 4 + x * 4 + c, x * Co + co] = wgt
    return A


def pack_params(pt_params, W):
    (conv1_w, conv2_w, conv2_b, conv1_w4, conv2_w4, conv2_b4, wsc4, alphas) = pt_params
    A = np.stack([_build_asym_matrix(conv1_w[i], conv2_w[i], W) for i in range(4)])
    A4 = _build_asym_matrix(conv1_w4, conv2_w4, W)
    Asc = _build_pointwise_matrix(wsc4, W)
    b_all = [np.asarray(b, np.float32) for b in conv2_b] + [np.asarray(conv2_b4, np.float32)]
    Bl = np.stack([np.tile(b, W) for b in b_all])                      # (5, W*4)
    Al = np.repeat(np.asarray(alphas, np.float32)[:, None], W * 4, axis=1)  # (5, W*4)
    return (jnp.asarray(A), jnp.asarray(A4), jnp.asarray(Asc),
            jnp.asarray(Bl), jnp.asarray(Al))


# ---------------------------------------------------------------------------
# Deterministic parameter init (PyTorch OIHW layout)
# ---------------------------------------------------------------------------
def init_params(key):
    keys = iter(jax.random.split(key, 16))
    conv1_w, conv2_w, conv2_b = [], [], []
    for _ in range(4):                               # blocks 0..3: in=4, out=4
        conv1_w.append(jax.random.normal(next(keys), (4, 4, 3, 1), jnp.float32) * 0.2)
        conv2_w.append(jax.random.normal(next(keys), (4, 4, 1, 3), jnp.float32) * 0.2)
        conv2_b.append(jax.random.normal(next(keys), (4,), jnp.float32) * 0.1)
    conv1_w4 = jax.random.normal(next(keys), (4, 20, 3, 1), jnp.float32) * 0.2
    conv2_w4 = jax.random.normal(next(keys), (4, 20, 1, 3), jnp.float32) * 0.2
    conv2_b4 = jax.random.normal(next(keys), (4,), jnp.float32) * 0.1
    wsc4 = jax.random.normal(next(keys), (4, 20, 1, 1), jnp.float32) * 0.2
    alphas = jnp.full((5,), 0.25, jnp.float32)       # nn.PReLU() default init
    return (conv1_w, conv2_w, conv2_b, conv1_w4, conv2_w4, conv2_b4, wsc4, alphas)


# ---------------------------------------------------------------------------
# Pure-JAX reference (mirrors the PyTorch module, NCHW / lax.conv)
# ---------------------------------------------------------------------------
def torch_ref(x, pt_params):
    (conv1_w, conv2_w, conv2_b, conv1_w4, conv2_w4, conv2_b4, wsc4, alphas) = pt_params

    def conv(x, w, padding, b=None):
        y = lax.conv_general_dilated(x, w, window_strides=(1, 1), padding=padding,
                                     dimension_numbers=("NCHW", "OIHW", "NCHW"))
        if b is not None:
            y = y + b[None, :, None, None]
        return y

    def prelu(z, a):
        return jnp.where(z >= 0, z, a * z)

    def asym(inp, w1, w2, b2, a, wsc=None):
        sc = inp if wsc is None else conv(inp, wsc, ((0, 0), (0, 0)))
        c1 = conv(inp, w1, ((1, 1), (0, 0)))
        c2 = conv(inp, w2, ((0, 0), (1, 1)), b2)
        return prelu(c1 + c2, a) + sc

    x0 = asym(x, conv1_w[0], conv2_w[0], conv2_b[0], alphas[0])
    x1 = asym(x0, conv1_w[1], conv2_w[1], conv2_b[1], alphas[1])
    x2 = asym(x1, conv1_w[2], conv2_w[2], conv2_b[2], alphas[2])
    x3 = asym(x2, conv1_w[3], conv2_w[3], conv2_b[3], alphas[3])
    cat = jnp.concatenate([x, x0, x1, x2, x3], axis=1)
    x4 = asym(cat, conv1_w4, conv2_w4, conv2_b4, alphas[4], wsc4)
    threshold = jax.nn.sigmoid(x4)
    sparse_x = jnp.where(x > threshold, x, jnp.zeros_like(x))
    return sparse_x, threshold


if __name__ == "__main__":
    key = jax.random.PRNGKey(0)
    kx, kp = jax.random.split(key)
    x = jax.random.normal(kx, (2, 4, 16, 16), jnp.float32)   # NCHW, C=4

    pt_params = init_params(kp)
    kern_params = pack_params(pt_params, W=x.shape[3])

    out = jax.block_until_ready(t_branch_forward(x, kern_params))

    ref, thr = torch_ref(x, pt_params)
    # allow disagreement only exactly at the x ~= threshold decision boundary
    boundary = jnp.abs(x - thr) < 1e-3
    ok = bool(jnp.all((jnp.abs(out - ref) < 1e-4) | boundary))
    assert ok, f"max abs err = {float(jnp.max(jnp.abs(out - ref)))}"

    print("KERNEL_OK")
</pallas_src>

<mosaic_0001>
module attributes {stable_mosaic.version = 11 : i64} {
  func.func @t_branch_kernel(%arg0: i32, %arg1: memref<1x16x64xf32, #tpu.memory_space<vmem>>, %arg2: memref<4x192x64xf32, #tpu.memory_space<vmem>>, %arg3: memref<960x64xf32, #tpu.memory_space<vmem>>, %arg4: memref<320x64xf32, #tpu.memory_space<vmem>>, %arg5: memref<5x64xf32, #tpu.memory_space<vmem>>, %arg6: memref<5x64xf32, #tpu.memory_space<vmem>>, %arg7: memref<1x16x64xf32, #tpu.memory_space<vmem>>) attributes {dimension_semantics = [#tpu.dimension_semantics<parallel>], iteration_bounds = array<i64: 2>, scalar_prefetch = 0 : i64, scratch_operands = 0 : i64, tpu.core_type = #tpu.core_type<tc>, window_params = [{transform_indices = @transform_0, window_bounds = array<i64: 1, 16, 64>}, {pipeline_mode = #tpu.pipeline_mode<synchronous>, transform_indices = @transform_1, window_bounds = array<i64: 4, 192, 64>}, {pipeline_mode = #tpu.pipeline_mode<synchronous>, transform_indices = @transform_2, window_bounds = array<i64: 960, 64>}, {pipeline_mode = #tpu.pipeline_mode<synchronous>, transform_indices = @transform_3, window_bounds = array<i64: 320, 64>}, {pipeline_mode = #tpu.pipeline_mode<synchronous>, transform_indices = @transform_4, window_bounds = array<i64: 5, 64>}, {pipeline_mode = #tpu.pipeline_mode<synchronous>, transform_indices = @transform_5, window_bounds = array<i64: 5, 64>}, {transform_indices = @transform_6, window_bounds = array<i64: 1, 16, 64>}]} {
    %c0 = arith.constant 0 : index
    %c0_0 = arith.constant 0 : index
    %c0_1 = arith.constant 0 : index
    %0 = vector.load %arg1[%c0, %c0_0, %c0_1] : memref<1x16x64xf32, #tpu.memory_space<vmem>>, vector<1x16x64xf32>
    %1 = vector.shape_cast %0 : vector<1x16x64xf32> to vector<16x64xf32>
    %c0_2 = arith.constant 0 : index
    %c0_3 = arith.constant 0 : index
    %2 = vector.load %arg5[%c0_2, %c0_3] : memref<5x64xf32, #tpu.memory_space<vmem>>, vector<5x64xf32>
    %c0_4 = arith.constant 0 : index
    %c0_5 = arith.constant 0 : index
    %3 = vector.load %arg6[%c0_4, %c0_5] : memref<5x64xf32, #tpu.memory_space<vmem>>, vector<5x64xf32>
    %c0_6 = arith.constant 0 : index
    %c0_7 = arith.constant 0 : index
    %c0_8 = arith.constant 0 : index
    %4 = vector.load %arg2[%c0_6, %c0_7, %c0_8] : memref<4x192x64xf32, #tpu.memory_space<vmem>>, vector<1x192x64xf32>
    %5 = vector.shape_cast %4 : vector<1x192x64xf32> to vector<192x64xf32>
    %c1_i32 = arith.constant 1 : i32
    %6 = tpu.dynamic_rotate %1 by %c1_i32 dim 0 : vector<16x64xf32>, i32 -> vector<16x64xf32>
    %7 = tpu.iota {dimensions = array<i32: 0>} : vector<16x64xi32>
    %c0_i32 = arith.constant 0 : i32
    %8 = vector.broadcast %c0_i32 : i32 to vector<16x64xi32>
    %9 = arith.cmpi eq, %7, %8 : vector<16x64xi32>
    %cst = arith.constant 0.000000e+00 : f32
    %10 = vector.broadcast %cst : f32 to vector<16x64xf32>
    %11 = arith.select %9, %10, %6 : vector<16x64xi1>, vector<16x64xf32>
    %c15_i32 = arith.constant 15 : i32
    %12 = tpu.dynamic_rotate %1 by %c15_i32 dim 0 : vector<16x64xf32>, i32 -> vector<16x64xf32>
    %13 = tpu.iota {dimensions = array<i32: 0>} : vector<16x64xi32>
    %c15_i32_9 = arith.constant 15 : i32
    %14 = vector.broadcast %c15_i32_9 : i32 to vector<16x64xi32>
    %15 = arith.cmpi eq, %13, %14 : vector<16x64xi32>
    %cst_10 = arith.constant 0.000000e+00 : f32
    %16 = vector.broadcast %cst_10 : f32 to vector<16x64xf32>
    %17 = arith.select %15, %16, %12 : vector<16x64xi1>, vector<16x64xf32>
    %18 = tpu.concatenate %11, %1, %17 in 1 : vector<16x64xf32>, vector<16x64xf32>, vector<16x64xf32> -> vector<16x192xf32>
    %cst_11 = arith.constant dense<0.000000e+00> : vector<16x64xf32>
    %19 = tpu.matmul %18, %5, %cst_11 {dimension_numbers = #tpu.dot_dimension_numbers<[1], [0], [0], [1], [0, 0, 1, 1], [], []>} : vector<16x192xf32>, vector<192x64xf32>, vector<16x64xf32> -> vector<16x64xf32>
    %20 = vector.extract_strided_slice %2 {offsets = [0, 0], sizes = [1, 64], strides = [1, 1]} : vector<5x64xf32> to vector<1x64xf32>
    %21 = vector.broadcast %20 : vector<1x64xf32> to vector<16x64xf32>
    %22 = arith.addf %19, %21 : vector<16x64xf32>
    %cst_12 = arith.constant 0.000000e+00 : f32
    %23 = vector.broadcast %cst_12 : f32 to vector<16x64xf32>
    %24 = arith.cmpf oge, %22, %23 : vector<16x64xf32>
    %25 = vector.extract_strided_slice %3 {offsets = [0, 0], sizes = [1, 64], strides = [1, 1]} : vector<5x64xf32> to vector<1x64xf32>
    %26 = vector.broadcast %25 : vector<1x64xf32> to vector<16x64xf32>
    %27 = arith.mulf %26, %22 : vector<16x64xf32>
    %28 = arith.select %24, %22, %27 : vector<16x64xi1>, vector<16x64xf32>
    %29 = arith.addf %28, %1 : vector<16x64xf32>
    %c1 = arith.constant 1 : index
    %c0_13 = arith.constant 0 : index
    %c0_14 = arith.constant 0 : index
    %30 = vector.load %arg2[%c1, %c0_13, %c0_14] : memref<4x192x64xf32, #tpu.memory_space<vmem>>, vector<1x192x64xf32>
    %31 = vector.shape_cast %30 : vector<1x192x64xf32> to vector<192x64xf32>
    %c1_i32_15 = arith.constant 1 : i32
    %32 = tpu.dynamic_rotate %29 by %c1_i32_15 dim 0 : vector<16x64xf32>, i32 -> vector<16x64xf32>
    %33 = tpu.iota {dimensions = array<i32: 0>} : vector<16x64xi32>
    %c0_i32_16 = arith.constant 0 : i32
    %34 = vector.broadcast %c0_i32_16 : i32 to vector<16x64xi32>
    %35 = arith.cmpi eq, %33, %34 : vector<16x64xi32>
    %cst_17 = arith.constant 0.000000e+00 : f32
    %36 = vector.broadcast %cst_17 : f32 to vector<16x64xf32>
    %37 = arith.select %35, %36, %32 : vector<16x64xi1>, vector<16x64xf32>
    %c15_i32_18 = arith.constant 15 : i32
    %38 = tpu.dynamic_rotate %29 by %c15_i32_18 dim 0 : vector<16x64xf32>, i32 -> vector<16x64xf32>
    %39 = tpu.iota {dimensions = array<i32: 0>} : vector<16x64xi32>
    %c15_i32_19 = arith.constant 15 : i32
    %40 = vector.broadcast %c15_i32_19 : i32 to vector<16x64xi32>
    %41 = arith.cmpi eq, %39, %40 : vector<16x64xi32>
    %cst_20 = arith.constant 0.000000e+00 : f32
    %42 = vector.broadcast %cst_20 : f32 to vector<16x64xf32>
    %43 = arith.select %41, %42, %38 : vector<16x64xi1>, vector<16x64xf32>
    %44 = tpu.concatenate %37, %29, %43 in 1 : vector<16x64xf32>, vector<16x64xf32>, vector<16x64xf32> -> vector<16x192xf32>
    %cst_21 = arith.constant dense<0.000000e+00> : vector<16x64xf32>
    %45 = tpu.matmul %44, %31, %cst_21 {dimension_numbers = #tpu.dot_dimension_numbers<[1], [0], [0], [1], [0, 0, 1, 1], [], []>} : vector<16x192xf32>, vector<192x64xf32>, vector<16x64xf32> -> vector<16x64xf32>
    %46 = vector.extract_strided_slice %2 {offsets = [1, 0], sizes = [1, 64], strides = [1, 1]} : vector<5x64xf32> to vector<1x64xf32>
    %47 = vector.broadcast %46 : vector<1x64xf32> to vector<16x64xf32>
    %48 = arith.addf %45, %47 : vector<16x64xf32>
    %cst_22 = arith.constant 0.000000e+00 : f32
    %49 = vector.broadcast %cst_22 : f32 to vector<16x64xf32>
    %50 = arith.cmpf oge, %48, %49 : vector<16x64xf32>
    %51 = vector.extract_strided_slice %3 {offsets = [1, 0], sizes = [1, 64], strides = [1, 1]} : vector<5x64xf32> to vector<1x64xf32>
    %52 = vector.broadcast %51 : vector<1x64xf32> to vector<16x64xf32>
    %53 = arith.mulf %52, %48 : vector<16x64xf32>
    %54 = arith.select %50, %48, %53 : vector<16x64xi1>, vector<16x64xf32>
    %55 = arith.addf %54, %29 : vector<16x64xf32>
    %c2 = arith.constant 2 : index
    %c0_23 = arith.constant 0 : index
    %c0_24 = arith.constant 0 : index
    %56 = vector.load %arg2[%c2, %c0_23, %c0_24] : memref<4x192x64xf32, #tpu.memory_space<vmem>>, vector<1x192x64xf32>
    %57 = vector.shape_cast %56 : vector<1x192x64xf32> to vector<192x64xf32>
    %c1_i32_25 = arith.constant 1 : i32
    %58 = tpu.dynamic_rotate %55 by %c1_i32_25 dim 0 : vector<16x64xf32>, i32 -> vector<16x64xf32>
    %59 = tpu.iota {dimensions = array<i32: 0>} : vector<16x64xi32>
    %c0_i32_26 = arith.constant 0 : i32
    %60 = vector.broadcast %c0_i32_26 : i32 to vector<16x64xi32>
    %61 = arith.cmpi eq, %59, %60 : vector<16x64xi32>
    %cst_27 = arith.constant 0.000000e+00 : f32
    %62 = vector.broadcast %cst_27 : f32 to vector<16x64xf32>
    %63 = arith.select %61, %62, %58 : vector<16x64xi1>, vector<16x64xf32>
    %c15_i32_28 = arith.constant 15 : i32
    %64 = tpu.dynamic_rotate %55 by %c15_i32_28 dim 0 : vector<16x64xf32>, i32 -> vector<16x64xf32>
    %65 = tpu.iota {dimensions = array<i32: 0>} : vector<16x64xi32>
    %c15_i32_29 = arith.constant 15 : i32
    %66 = vector.broadcast %c15_i32_29 : i32 to vector<16x64xi32>
    %67 = arith.cmpi eq, %65, %66 : vector<16x64xi32>
    %cst_30 = arith.constant 0.000000e+00 : f32
    %68 = vector.broadcast %cst_30 : f32 to vector<16x64xf32>
    %69 = arith.select %67, %68, %64 : vector<16x64xi1>, vector<16x64xf32>
    %70 = tpu.concatenate %63, %55, %69 in 1 : vector<16x64xf32>, vector<16x64xf32>, vector<16x64xf32> -> vector<16x192xf32>
    %cst_31 = arith.constant dense<0.000000e+00> : vector<16x64xf32>
    %71 = tpu.matmul %70, %57, %cst_31 {dimension_numbers = #tpu.dot_dimension_numbers<[1], [0], [0], [1], [0, 0, 1, 1], [], []>} : vector<16x192xf32>, vector<192x64xf32>, vector<16x64xf32> -> vector<16x64xf32>
    %72 = vector.extract_strided_slice %2 {offsets = [2, 0], sizes = [1, 64], strides = [1, 1]} : vector<5x64xf32> to vector<1x64xf32>
    %73 = vector.broadcast %72 : vector<1x64xf32> to vector<16x64xf32>
    %74 = arith.addf %71, %73 : vector<16x64xf32>
    %cst_32 = arith.constant 0.000000e+00 : f32
    %75 = vector.broadcast %cst_32 : f32 to vector<16x64xf32>
    %76 = arith.cmpf oge, %74, %75 : vector<16x64xf32>
    %77 = vector.extract_strided_slice %3 {offsets = [2, 0], sizes = [1, 64], strides = [1, 1]} : vector<5x64xf32> to vector<1x64xf32>
    %78 = vector.broadcast %77 : vector<1x64xf32> to vector<16x64xf32>
    %79 = arith.mulf %78, %74 : vector<16x64xf32>
    %80 = arith.select %76, %74, %79 : vector<16x64xi1>, vector<16x64xf32>
    %81 = arith.addf %80, %55 : vector<16x64xf32>
    %c3 = arith.constant 3 : index
    %c0_33 = arith.constant 0 : index
    %c0_34 = arith.constant 0 : index
    %82 = vector.load %arg2[%c3, %c0_33, %c0_34] : memref<4x192x64xf32, #tpu.memory_space<vmem>>, vector<1x192x64xf32>
    %83 = vector.shape_cast %82 : vector<1x192x64xf32> to vector<192x64xf32>
    %c1_i32_35 = arith.constant 1 : i32
    %84 = tpu.dynamic_rotate %81 by %c1_i32_35 dim 0 : vector<16x64xf32>, i32 -> vector<16x64xf32>
    %85 = tpu.iota {dimensions = array<i32: 0>} : vector<16x64xi32>
    %c0_i32_36 = arith.constant 0 : i32
    %86 = vector.broadcast %c0_i32_36 : i32 to vector<16x64xi32>
    %87 = arith.cmpi eq, %85, %86 : vector<16x64xi32>
    %cst_37 = arith.constant 0.000000e+00 : f32
    %88 = vector.broadcast %cst_37 : f32 to vector<16x64xf32>
    %89 = arith.select %87, %88, %84 : vector<16x64xi1>, vector<16x64xf32>
    %c15_i32_38 = arith.constant 15 : i32
    %90 = tpu.dynamic_rotate %81 by %c15_i32_38 dim 0 : vector<16x64xf32>, i32 -> vector<16x64xf32>
    %91 = tpu.iota {dimensions = array<i32: 0>} : vector<16x64xi32>
    %c15_i32_39 = arith.constant 15 : i32
    %92 = vector.broadcast %c15_i32_39 : i32 to vector<16x64xi32>
    %93 = arith.cmpi eq, %91, %92 : vector<16x64xi32>
    %cst_40 = arith.constant 0.000000e+00 : f32
    %94 = vector.broadcast %cst_40 : f32 to vector<16x64xf32>
    %95 = arith.select %93, %94, %90 : vector<16x64xi1>, vector<16x64xf32>
    %96 = tpu.concatenate %89, %81, %95 in 1 : vector<16x64xf32>, vector<16x64xf32>, vector<16x64xf32> -> vector<16x192xf32>
    %cst_41 = arith.constant dense<0.000000e+00> : vector<16x64xf32>
    %97 = tpu.matmul %96, %83, %cst_41 {dimension_numbers = #tpu.dot_dimension_numbers<[1], [0], [0], [1], [0, 0, 1, 1], [], []>} : vector<16x192xf32>, vector<192x64xf32>, vector<16x64xf32> -> vector<16x64xf32>
    %98 = vector.extract_strided_slice %2 {offsets = [3, 0], sizes = [1, 64], strides = [1, 1]} : vector<5x64xf32> to vector<1x64xf32>
    %99 = vector.broadcast %98 : vector<1x64xf32> to vector<16x64xf32>
    %100 = arith.addf %97, %99 : vector<16x64xf32>
    %cst_42 = arith.constant 0.000000e+00 : f32
    %101 = vector.broadcast %cst_42 : f32 to vector<16x64xf32>
    %102 = arith.cmpf oge, %100, %101 : vector<16x64xf32>
    %103 = vector.extract_strided_slice %3 {offsets = [3, 0], sizes = [1, 64], strides = [1, 1]} : vector<5x64xf32> to vector<1x64xf32>
    %104 = vector.broadcast %103 : vector<1x64xf32> to vector<16x64xf32>
    %105 = arith.mulf %104, %100 : vector<16x64xf32>
    %106 = arith.select %102, %100, %105 : vector<16x64xi1>, vector<16x64xf32>
    %107 = arith.addf %106, %81 : vector<16x64xf32>
    %108 = tpu.concatenate %1, %29, %55, %81, %107 in 1 : vector<16x64xf32>, vector<16x64xf32>, vector<16x64xf32>, vector<16x64xf32>, vector<16x64xf32> -> vector<16x320xf32>
    %c0_43 = arith.constant 0 : index
    %c0_44 = arith.constant 0 : index
    %109 = vector.load %arg3[%c0_43, %c0_44] : memref<960x64xf32, #tpu.memory_space<vmem>>, vector<960x64xf32>
    %c1_i32_45 = arith.constant 1 : i32
    %110 = tpu.dynamic_rotate %108 by %c1_i32_45 dim 0 : vector<16x320xf32>, i32 -> vector<16x320xf32>
    %111 = tpu.iota {dimensions = array<i32: 0>} : vector<16x320xi32>
    %c0_i32_46 = arith.constant 0 : i32
    %112 = vector.broadcast %c0_i32_46 : i32 to vector<16x320xi32>
    %113 = arith.cmpi eq, %111, %112 : vector<16x320xi32>
    %cst_47 = arith.constant 0.000000e+00 : f32
    %114 = vector.broadcast %cst_47 : f32 to vector<16x320xf32>
    %115 = arith.select %113, %114, %110 : vector<16x320xi1>, vector<16x320xf32>
    %c15_i32_48 = arith.constant 15 : i32
    %116 = tpu.dynamic_rotate %108 by %c15_i32_48 dim 0 : vector<16x320xf32>, i32 -> vector<16x320xf32>
    %117 = tpu.iota {dimensions = array<i32: 0>} : vector<16x320xi32>
    %c15_i32_49 = arith.constant 15 : i32
    %118 = vector.broadcast %c15_i32_49 : i32 to vector<16x320xi32>
    %119 = arith.cmpi eq, %117, %118 : vector<16x320xi32>
    %cst_50 = arith.constant 0.000000e+00 : f32
    %120 = vector.broadcast %cst_50 : f32 to vector<16x320xf32>
    %121 = arith.select %119, %120, %116 : vector<16x320xi1>, vector<16x320xf32>
    %122 = tpu.concatenate %115, %108, %121 in 1 : vector<16x320xf32>, vector<16x320xf32>, vector<16x320xf32> -> vector<16x960xf32>
    %cst_51 = arith.constant dense<0.000000e+00> : vector<16x64xf32>
    %123 = tpu.matmul %122, %109, %cst_51 {dimension_numbers = #tpu.dot_dimension_numbers<[1], [0], [0], [1], [0, 0, 1, 1], [], []>} : vector<16x960xf32>, vector<960x64xf32>, vector<16x64xf32> -> vector<16x64xf32>
    %124 = vector.extract_strided_slice %2 {offsets = [4, 0], sizes = [1, 64], strides = [1, 1]} : vector<5x64xf32> to vector<1x64xf32>
    %125 = vector.broadcast %124 : vector<1x64xf32> to vector<16x64xf32>
    %126 = arith.addf %123, %125 : vector<16x64xf32>
    %cst_52 = arith.constant 0.000000e+00 : f32
    %127 = vector.broadcast %cst_52 : f32 to vector<16x64xf32>
    %128 = arith.cmpf oge, %126, %127 : vector<16x64xf32>
    %129 = vector.extract_strided_slice %3 {offsets = [4, 0], sizes = [1, 64], strides = [1, 1]} : vector<5x64xf32> to vector<1x64xf32>
    %130 = vector.broadcast %129 : vector<1x64xf32> to vector<16x64xf32>
    %131 = arith.mulf %130, %126 : vector<16x64xf32>
    %132 = arith.select %128, %126, %131 : vector<16x64xi1>, vector<16x64xf32>
    %c0_53 = arith.constant 0 : index
    %c0_54 = arith.constant 0 : index
    %133 = vector.load %arg4[%c0_53, %c0_54] : memref<320x64xf32, #tpu.memory_space<vmem>>, vector<320x64xf32>
    %cst_55 = arith.constant dense<0.000000e+00> : vector<16x64xf32>
    %134 = tpu.matmul %108, %133, %cst_55 {dimension_numbers = #tpu.dot_dimension_numbers<[1], [0], [0], [1], [0, 0, 1, 1], [], []>} : vector<16x320xf32>, vector<320x64xf32>, vector<16x64xf32> -> vector<16x64xf32>
    %135 = arith.addf %132, %134 : vector<16x64xf32>
    %136 = arith.negf %135 : vector<16x64xf32>
    %137 = math.exp %136 : vector<16x64xf32>
    %cst_56 = arith.constant 1.000000e+00 : f32
    %138 = vector.broadcast %cst_56 : f32 to vector<16x64xf32>
    %139 = arith.addf %138, %137 : vector<16x64xf32>
    %140 = arith.divf %138, %139 : vector<16x64xf32>
    %141 = arith.cmpf ogt, %1, %140 : vector<16x64xf32>
    %cst_57 = arith.constant 0.000000e+00 : f32
    %142 = vector.broadcast %cst_57 : f32 to vector<16x64xf32>
    %143 = arith.select %141, %1, %142 : vector<16x64xi1>, vector<16x64xf32>
    %c0_58 = arith.constant 0 : index
    %c0_59 = arith.constant 0 : index
    %c0_60 = arith.constant 0 : index
    %144 = vector.load %arg7[%c0_58, %c0_59, %c0_60] : memref<1x16x64xf32, #tpu.memory_space<vmem>>, vector<1x16x64xf32>
    %145 = vector.shape_cast %144 : vector<1x16x64xf32> to vector<16x64xf32>
    %146 = vector.shape_cast %143 : vector<16x64xf32> to vector<1x16x64xf32>
    tpu.vector_store %arg7[%c0_58, %c0_59, %c0_60], %146 {strides = array<i32>} : memref<1x16x64xf32, #tpu.memory_space<vmem>>, vector<1x16x64xf32>,
    return
  }
  func.func @transform_0(%arg0: i32) -> (i32, i32, i32) {
    %c0_i32 = arith.constant 0 : i32
    %c0_i32_0 = arith.constant 0 : i32
    %c0_i32_1 = arith.constant 0 : i32
    return %arg0, %c0_i32, %c0_i32_0 : i32, i32, i32
  }
  func.func @transform_1(%arg0: i32) -> (i32, i32, i32) {
    %c0_i32 = arith.constant 0 : i32
    %c0_i32_0 = arith.constant 0 : i32
    %c0_i32_1 = arith.constant 0 : i32
    %c0_i32_2 = arith.constant 0 : i32
    return %c0_i32, %c0_i32_0, %c0_i32_1 : i32, i32, i32
  }
  func.func @transform_2(%arg0: i32) -> (i32, i32) {
    %c0_i32 = arith.constant 0 : i32
    %c0_i32_0 = arith.constant 0 : i32
    %c0_i32_1 = arith.constant 0 : i32
    return %c0_i32, %c0_i32_0 : i32, i32
  }
  func.func @transform_3(%arg0: i32) -> (i32, i32) {
    %c0_i32 = arith.constant 0 : i32
    %c0_i32_0 = arith.constant 0 : i32
    %c0_i32_1 = arith.constant 0 : i32
    return %c0_i32, %c0_i32_0 : i32, i32
  }
  func.func @transform_4(%arg0: i32) -> (i32, i32) {
    %c0_i32 = arith.constant 0 : i32
    %c0_i32_0 = arith.constant 0 : i32
    %c0_i32_1 = arith.constant 0 : i32
    return %c0_i32, %c0_i32_0 : i32, i32
  }
  func.func @transform_5(%arg0: i32) -> (i32, i32) {
    %c0_i32 = arith.constant 0 : i32
    %c0_i32_0 = arith.constant 0 : i32
    %c0_i32_1 = arith.constant 0 : i32
    return %c0_i32, %c0_i32_0 : i32, i32
  }
  func.func @transform_6(%arg0: i32) -> (i32, i32, i32) {
    %c0_i32 = arith.constant 0 : i32
    %c0_i32_0 = arith.constant 0 : i32
    %c0_i32_1 = arith.constant 0 : i32
    return %arg0, %c0_i32, %c0_i32_0 : i32, i32, i32
  }
}

</mosaic_0001>

<bundles_post_ra>
// kernel: tpu_custom_call.1
= control target key start
LH: loop header
LB: loop body
LE: loop exit
PB: predicated region body
PF: predicated region fallthrough
CT: control target
= control target key end

     0   :  { %11 = vsyncpa [#allocation3], 0  ;;  %s3661_s0 = inlined_call_operand.vmem [shape: f32[2,16,64], index: 0, kind: input, shape index: {}]   ;;  %s3662_s1 = inlined_call_operand.vmem [shape: f32[4,192,64], index: 1, kind: input, shape index: {}]   ;;  %s3663_s2 = inlined_call_operand.vmem [shape: f32[960,64], index: 2, kind: input, shape index: {}]   ;;  %s3664_s3 = inlined_call_operand.vmem [shape: f32[320,64], index: 3, kind: input, shape index: {}]   ;;  %s3665_s4 = inlined_call_operand.vmem [shape: f32[5,64], index: 4, kind: input, shape index: {}]   ;;  %s3666_s5 = inlined_call_operand.vmem [shape: f32[5,64], index: 5, kind: input, shape index: {}]   ;;  %s3667_s6 = inlined_call_operand.hbm [shape: f32[2,16,64], index: 6, kind: output, shape index: {}]  }
   0x1   :  { %13 = vsyncpa [#allocation3 + $0x1], 0  ;;  %s2421_s21 = smov 0   ;;  %s2423_s22 = smov 0  }
   0x2   :  { %s2425_s23 = smov 0   ;;  %s2427_s24 = smov 0  }
   0x3 LB: > { %s2442_s25 = sadd.s32 4294967295, %s2379_s24   ;;  %s1639_s26 = sadd.s32 4294967294, %s2379_s24   ;;  %s2379_s24 = sphi %s2427_s24, %s3675_s24   ;;  %s2375_s23 = sphi %s2425_s23, %s3674_s23   ;;  %s2371_s22 = sphi %s2423_s22, %s3673_s22   ;;  %s2367_s21 = sphi %s2421_s21, %s3672_s21  }
   0x4   : > { %s2446_s27 = sadd.s32 1, %s2379_s24   ;;  %s157_s28 = sadd.s32 1, %s2375_s23 }
   0x5   : > { %s154_s29 = ssub.s32 %s2379_s24, %s2446_s27  ;;  %p167_p0 = scmp.ne.s32.totalorder %s2375_s23, %s2371_s22 }
   0x6   : > { %p155_p1 = scmp.eq.s32.totalorder %s154_s29, 0  ;;  %p168_p2 = scmp.eq.s32.totalorder %s2442_s25, 1 }
   0x7   : > { %p173_p3 = scmp.ne.s32.totalorder %s2371_s22, %s2367_s21  ;;  %p174_p4 = scmp.eq.s32.totalorder %s1639_s26, 1 }
   0x8   : > { %s2457_s30 = scalar_select %p155_p1, %s2375_s23, %s157_s28  }
   0x9   : > { %p2459_p5 = por %p168_p2, %p167_p0  ;;  %p2463_p6 = por %p174_p4, %p173_p3 }
   0xa   : > { %p1642_p7 = scmp.ge.s32.totalorder %s2379_s24, 1  ;;  %p215_p8 = scmp.lt.s32.totalorder %s2379_s24, 3 }
   0xc   : > { %p216_p9 = pnand %p1642_p7, %p215_p8 }
   0xd   : > { %p245_p10 = scmp.lt.s32.totalorder (!%p216_p9), %s2442_s25, 1  ;;  %v254_v0 = vld [vmem:[%s3662_s1] sm:$0xff] (!%p216_p9)  ;;  %v255_v1 = vld [vmem:[%s3662_s1 + $0x8] sm:$0xff] (!%p216_p9)  ;;  %v256_v2 = vld [vmem:[%s3662_s1 + $0x10] sm:$0xff] (!%p216_p9)  ;;  %v280_v3 = vlaneseq (!%p216_p9)  ;;  %v2381_v4 = vmov (!%p216_p9), 0.0|0.0   ;;  %s2382_s11 = smov (!%p216_p9), 64  }
   0xe   : > { %219 = sbr.rel (%p216_p9) target bundleno = 1780 (0x6f4), region = 44  ;;  %1928 = vmatprep.subr.bf16.mxu0 (!%p216_p9), %v2381_v4  ;;  %v1929_v5 = vpack.c.bf16 (!%p216_p9), %v255_v1, %v254_v0  ;;  %v257_v6 = vld [vmem:[%s3662_s1 + $0x18] sm:$0xff] (!%p216_p9)  ;;  %1964 = vmatprep.subr.bf16.mxu1 (!%p216_p9), %v2381_v4  ;;  %v258_v9 = vld [vmem:[%s3662_s1 + $0x20] sm:$0xff] (!%p216_p9)  ;;  %v259_v10 = vld [vmem:[%s3662_s1 + $0x28] sm:$0xff] (!%p216_p9)  ;;  %vm307_vm1 = vcmask (!%p216_p9), 523264   ;;  %s1746_s19 = sshll.u32 (!%p216_p9), %s2442_s25, 8 }
   0xf   : > { %v2485_v7 = vshrl.u32 (!%p216_p9), %v280_v3, 7  ;;  %v1932_v8 = vpack.c.bf16 (!%p216_p9), %v257_v6, %v256_v2  ;;  %v1935_v13 = vpack.c.bf16 (!%p216_p9), %v259_v10, %v258_v9  ;;  %v260_v16 = vld [vmem:[%s3662_s1 + $0x30] sm:$0xff] (!%p216_p9)  ;;  %v261_v17 = vld [vmem:[%s3662_s1 + $0x38] sm:$0xff] (!%p216_p9)  ;;  %v262_v21 = vld [vmem:[%s3662_s1 + $0x40] sm:$0xff] (!%p216_p9)  ;;  %s3614_s29 = scalar_lea.hbm (!%p216_p9), %s3667_s6, %s1746_s19  ;;  %s2383_s12 = smov (!%p216_p9), [#allocation2]  }
  0x10   : > { %1930 = vmatpush1.bf16.msra.mxu0 (!%p216_p9), %v1929_v5  ;;  %v1938_v20 = vpack.c.bf16 (!%p216_p9), %v261_v17, %v260_v16  ;;  %v263_v22 = vld [vmem:[%s3662_s1 + $0x48] sm:$0xff] (!%p216_p9)  ;;  %v264_v24 = vld [vmem:[%s3662_s1 + $0x50] sm:$0xff] (!%p216_p9)  ;;  %v265_v25 = vld [vmem:[%s3662_s1 + $0x58] sm:$0xff] (!%p216_p9)  ;;  %s2321_s13 = sshll.u32 (!%p216_p9), %s2383_s12, 4  ;;  %s2322_s13 = int_to_ptr.vmem [resolvable:$false] %s2321_s13 }
  0x11   : > { %1931 = vmatprep.subr.bf16.mxu0 (!%p216_p9), %v2381_v4  ;;  %vm292_vm0 = vcmp.lt.s32.totalorder (!%p216_p9), %v2485_v7, 7  ;;  %v1941_v23 = vpack.c.bf16 (!%p216_p9), %v263_v22, %v262_v21  ;;  %v1944_v26 = vpack.c.bf16 (!%p216_p9), %v265_v25, %v264_v24  ;;  %v266_v27 = vld [vmem:[%s3662_s1 + $0x60] sm:$0xff] (!%p216_p9)  ;;  %v267_v28 = vld [vmem:[%s3662_s1 + $0x68] sm:$0xff] (!%p216_p9)  ;;  %v268_v30 = vld [vmem:[%s3662_s1 + $0x70] sm:$0xff] (!%p216_p9)  ;;  %vm282_vm2 = vcmp.lt.s32.totalorder (!%p216_p9), %v2485_v7, 1  ;;  %s2323_s14 = scalar_lea.vmem (!%p216_p9), %s2322_s13, 512 }
  0x12   : > { %v1947_v29 = vpack.c.bf16 (!%p216_p9), %v267_v28, %v266_v27  ;;  %v269_v31 = vld [vmem:[%s3662_s1 + $0x78] sm:$0xff] (!%p216_p9)  ;;  %v270_v33 = vld [vmem:[%s3662_s1 + $0x80] sm:$0xff] (!%p216_p9)  ;;  %v271_v34 = vld [vmem:[%s3662_s1 + $0x88] sm:$0xff] (!%p216_p9)  ;;  %v2586_v47 = vadd.s32 (!%p216_p9), 8, %v2485_v7  ;;  %vm286_vm3 = vcmp.eq.s32.totalorder (!%p216_p9), %v2485_v7, 0 }
  0x13   : > { %v1950_v32 = vpack.c.bf16 (!%p216_p9), %v269_v31, %v268_v30  ;;  %v1953_v35 = vpack.c.bf16 (!%p216_p9), %v271_v34, %v270_v33  ;;  %v272_v36 = vld [vmem:[%s3662_s1 + $0x90] sm:$0xff] (!%p216_p9)  ;;  %v273_v37 = vld [vmem:[%s3662_s1 + $0x98] sm:$0xff] (!%p216_p9)  ;;  %v274_v39 = vld [vmem:[%s3662_s1 + $0xa0] sm:$0xff] (!%p216_p9) }
  0x14   : > { %1933 = vmatpush1.bf16.msra.mxu0 (!%p216_p9), %v1932_v8  ;;  %v1956_v38 = vpack.c.bf16 (!%p216_p9), %v273_v37, %v272_v36  ;;  %v275_v40 = vld [vmem:[%s3662_s1 + $0xa8] sm:$0xff] (!%p216_p9)  ;;  %v276_v42 = vld [vmem:[%s3662_s1 + $0xb0] sm:$0xff] (!%p216_p9)  ;;  %v277_v43 = vld [vmem:[%s3662_s1 + $0xb8] sm:$0xff] (!%p216_p9)  ;;  %vm296_vm4 = vcmp.eq.s32.totalorder (!%p216_p9), %v2586_v47, 15 }
  0x15   : > { %s246_s17 = scalar_select %p245_p10, %s2442_s25, 1  ;;  %1934 = vmatprep.subr.bf16.mxu0 %v2381_v4  ;;  %v1959_v41 = vpack.c.bf16 %v275_v40, %v274_v39  ;;  %v1962_v44 = vpack.c.bf16 %v277_v43, %v276_v42  ;;  %v1648_v56 = vld [vmem:[%s3662_s1 + $0xc0] sm:$0xff]  ;;  %v1649_v57 = vld [vmem:[%s3662_s1 + $0xc8] sm:$0xff]  ;;  %v1650_v58 = vld [vmem:[%s3662_s1 + $0xd0] sm:$0xff] }
  0x16   : > { %v1965_v59 = vpack.c.bf16 %v1649_v57, %v1648_v56  ;;  %v1651_v60 = vld [vmem:[%s3662_s1 + $0xd8] sm:$0xff]  ;;  %v1652_v62 = vld [vmem:[%s3662_s1 + $0xe0] sm:$0xff]  ;;  %v1653_v63 = vld [vmem:[%s3662_s1 + $0xe8] sm:$0xff] }
  0x17   : > { %s1745_s18 = sshll.u32 %s246_s17, 4  ;;  %v1968_v61 = vpack.c.bf16 %v1651_v60, %v1650_v58  ;;  %v1971_v0 = vpack.c.bf16 %v1653_v63, %v1652_v62  ;;  %v1654_v1 = vld [vmem:[%s3662_s1 + $0xf0] sm:$0xff]  ;;  %v1655_v2 = vld [vmem:[%s3662_s1 + $0xf8] sm:$0xff]  ;;  %v1656_v5 = vld [vmem:[%s3662_s1 + $0x100] sm:$0xff]  ;;  %s242_s17 = sand.u32 1, %s2371_s22  }
  0x18   : > { %s2497_s10 = scalar_lea.vmem %s3661_s0, %s1745_s18  ;;  %1936 = vmatpush1.bf16.msra.mxu0 %v1935_v13  ;;  %1966 = vmatpush1.bf16.msra.mxu1 %v1965_v59  ;;  %v1974_v3 = vpack.c.bf16 %v1655_v2, %v1654_v1  ;;  %v1657_v6 = vld [vmem:[%s3662_s1 + $0x108] sm:$0xff]  ;;  %v1658_v9 = vld [vmem:[%s3662_s1 + $0x110] sm:$0xff]  ;;  %v1659_v10 = vld [vmem:[%s3662_s1 + $0x118] sm:$0xff]  ;;  %s1643_s18 = sshll.u32 %s242_s17, 4 }
  0x19   : > { %v2500_v11 = vld [vmem:[%s2497_s10] sm:$0xff]  ;;  %v2503_v12 = vld [vmem:[%s2497_s10 + $0x8] sm:$0xff]  ;;  %1937 = vmatprep.subr.bf16.mxu0 %v2381_v4  ;;  %1967 = vmatprep.subr.bf16.mxu1 %v2381_v4  ;;  %v1977_v8 = vpack.c.bf16 %v1657_v6, %v1656_v5  ;;  %v1980_v13 = vpack.c.bf16 %v1659_v10, %v1658_v9  ;;  %v1662_v17 = vld [vmem:[%s3662_s1 + $0x130] sm:$0xff]  ;;  %s3620_s25 = scalar_lea.sflag [#allocation3], %s242_s17 }
  0x1a   : > { %301 = vrot.lane.b32.xlu0 %v2500_v11, %s2382_s11  ;;  %v290_v14 = vrot.slane %v2500_v11, 1  ;;  %v291_v15 = vrot.slane %v2503_v12, 1  ;;  %v278_v45 = vrot.slane %v2500_v11, 7  ;;  %v279_v46 = vrot.slane %v2503_v12, 7  ;;  %v1665_v21 = vld [vmem:[%s3662_s1 + $0x148] sm:$0xff]  ;;  %v1667_v24 = vld [vmem:[%s3662_s1 + $0x158] sm:$0xff]  ;;  %vm1726_vm11 = vmneg %vm286_vm3 }
  0x1b   : > { %v1669_v27 = vld [vmem:[%s3662_s1 + $0x168] sm:$0xff]  ;;  %v1671_v30 = vld [vmem:[%s3662_s1 + $0x178] sm:$0xff]  ;;  %v2689_v33 = vld [vmem:[%s3665_s4] sm:$0x1f] }
  0x1c   : > { %v293_v18 = vsel %vm292_vm0, %v290_v14, %v291_v15  ;;  %v294_v19 = vsel %vm292_vm0, %v291_v15, %v290_v14  ;;  %1939 = vmatpush1.bf16.msra.mxu0 %v1938_v20  ;;  %v284_v48 = vsel %vm282_vm2, %v279_v46, %v278_v45  ;;  %v283_v53 = vsel %vm282_vm2, %v278_v45, %v279_v46  ;;  %v1660_v14 = vld [vmem:[%s3662_s1 + $0x120] sm:$0xff]  ;;  %v1661_v15 = vld [vmem:[%s3662_s1 + $0x128] sm:$0xff]  ;;  %v1676_v6 = vld [vmem:[%s3662_s1 + $0x190] sm:$0xff] }
  0x1d   : > { %1646 = vmatprep.mubr.msk.f32.mxu0 %vm307_vm1, %v293_v18  ;;  %1940 = vmatprep.subr.bf16.mxu0 %v2381_v4  ;;  %v288_v49 = vsel %vm286_vm3, 0.0, %v284_v48  ;;  %v298_v51 = vsel %vm296_vm4, 0.0, %v294_v19  ;;  %v1983_v16 = vpack.c.bf16 %v1661_v15, %v1660_v14  ;;  %v1663_v18 = vld [vmem:[%s3662_s1 + $0x138] sm:$0xff]  ;;  %v1664_v20 = vld [vmem:[%s3662_s1 + $0x140] sm:$0xff]  ;;  %v1675_v5 = vld [vmem:[%s3662_s1 + $0x188] sm:$0xff] }
  0x1e   : > { %303 = vrot.lane.b32.xlu0 %v2503_v12, %s2382_s11  ;;  %1969 = vmatpush1.bf16.msra.mxu1 %v1968_v61  ;;  %v1986_v19 = vpack.c.bf16 %v1663_v18, %v1662_v17  ;;  %v1989_v22 = vpack.c.bf16 %v1665_v21, %v1664_v20  ;;  %v2694_v34 = vld [vmem:[%s3666_s5] sm:$0x1f]  ;;  %v1677_v9 = vld [vmem:[%s3662_s1 + $0x198] sm:$0xff]  ;;  %v1679_v14 = vld [vmem:[%s3662_s1 + $0x1a8] sm:$0xff] }
  0x1f   : > { %1970 = vmatprep.subr.bf16.mxu1 %v2381_v4  ;;  %v2004_v10 = vpack.c.bf16 %v1677_v9, %v1676_v6  ;;  %v1681_v17 = vld [vmem:[%s3662_s1 + $0x1b8] sm:$0xff]  ;;  %v1683_v20 = vld [vmem:[%s3662_s1 + $0x1c8] sm:$0xff]  ;;  %vm3477_vm14 = vmneg %vm296_vm4 }
  0x20   : > { %1942 = vmatpush1.bf16.msra.mxu0 %v1941_v23  ;;  %v1666_v23 = vld [vmem:[%s3662_s1 + $0x150] sm:$0xff] }
  0x21   : > { %1943 = vmatprep.subr.bf16.mxu0 %v2381_v4  ;;  %v1992_v25 = vpack.c.bf16 %v1667_v24, %v1666_v23  ;;  %v1685_v23 = vld [vmem:[%s3662_s1 + $0x1d8] sm:$0xff] }
  0x22   : > { %1972 = vmatpush1.bf16.msra.mxu1 %v1971_v0 }
  0x23   : > { %1973 = vmatprep.subr.bf16.mxu1 %v2381_v4 }
  0x24   : > { %1945 = vmatpush1.bf16.msra.mxu0 %v1944_v26  ;;  %v1668_v26 = vld [vmem:[%s3662_s1 + $0x160] sm:$0xff] }
  0x25   : > { %1946 = vmatprep.subr.bf16.mxu0 %v2381_v4  ;;  %v1995_v28 = vpack.c.bf16 %v1669_v27, %v1668_v26  ;;  %v1687_v26 = vld [vmem:[%s3662_s1 + $0x1e8] sm:$0xff] }
  0x26   : > { %1975 = vmatpush1.bf16.msra.mxu1 %v1974_v3 }
  0x27   : > { %1976 = vmatprep.subr.bf16.mxu1 %v2381_v4 }
  0x28   : > { %1948 = vmatpush1.bf16.msra.mxu0 %v1947_v29  ;;  %v1670_v29 = vld [vmem:[%s3662_s1 + $0x170] sm:$0xff] }
  0x29   : > { %1949 = vmatprep.subr.bf16.mxu0 %v2381_v4  ;;  %v1998_v31 = vpack.c.bf16 %v1671_v30, %v1670_v29  ;;  %v1689_v29 = vld [vmem:[%s3662_s1 + $0x1f8] sm:$0xff] }
  0x2a   : > { %1978 = vmatpush1.bf16.msra.mxu1 %v1977_v8 }
  0x2b   : > { %1979 = vmatprep.subr.bf16.mxu1 %v2381_v4 }
  0x2c   : > { %1951 = vmatpush1.bf16.msra.mxu0 %v1950_v32  ;;  %v312_v32 = vsub.s32 0, %v2485_v7 }
  0x2d   : > { %1952 = vmatprep.subr.bf16.mxu0 %v2381_v4 }
  0x2e   : > { %1981 = vmatpush1.bf16.msra.mxu1 %v1980_v13  ;;  %v400_v36 = vrot.slane %v2694_v34, %v312_v32  ;;  %v1678_v13 = vld [vmem:[%s3662_s1 + $0x1a0] sm:$0xff] }
  0x2f   : > { %1982 = vmatprep.subr.bf16.mxu1 %v2381_v4  ;;  %v2007_v15 = vpack.c.bf16 %v1679_v14, %v1678_v13 }
  0x30   : > { %1954 = vmatpush1.bf16.msra.mxu0 %v1953_v35  ;;  %v313_v35 = vrot.slane %v2689_v33, %v312_v32  ;;  %v1691_v32 = vld [vmem:[%s3662_s1 + $0x208] sm:$0xff] }
  0x31   : > { %1955 = vmatprep.subr.bf16.mxu0 %v2381_v4 }
  0x32   : > { %1984 = vmatpush1.bf16.msra.mxu1 %v1983_v16  ;;  %v1680_v16 = vld [vmem:[%s3662_s1 + $0x1b0] sm:$0xff] }
  0x33   : > { %1985 = vmatprep.subr.bf16.mxu1 %v2381_v4  ;;  %v2010_v18 = vpack.c.bf16 %v1681_v17, %v1680_v16 }
  0x34   : > { %1957 = vmatpush1.bf16.msra.mxu0 %v1956_v38 }
  0x35   : > { %1958 = vmatprep.subr.bf16.mxu0 %v2381_v4 }
  0x36   : > { %1987 = vmatpush1.bf16.msra.mxu1 %v1986_v19  ;;  %v1682_v19 = vld [vmem:[%s3662_s1 + $0x1c0] sm:$0xff] }
  0x37   : > { %1988 = vmatprep.subr.bf16.mxu1 %v2381_v4  ;;  %v2013_v21 = vpack.c.bf16 %v1683_v20, %v1682_v19  ;;  %v1701_v19 = vld [vmem:[%s3662_s1 + $0x248] sm:$0xff]  ;;  %v1702_v20 = vld [vmem:[%s3662_s1 + $0x250] sm:$0xff] }
  0x38   : > { %1960 = vmatpush1.bf16.msra.mxu0 %v1959_v41 }
  0x39   : > { %1961 = vmatprep.subr.bf16.mxu0 %v2381_v4 }
  0x3a   : > { %1990 = vmatpush1.bf16.msra.mxu1 %v1989_v22  ;;  %v1684_v22 = vld [vmem:[%s3662_s1 + $0x1d0] sm:$0xff] }
  0x3b   : > { %1991 = vmatprep.subr.bf16.mxu1 %v2381_v4  ;;  %v2016_v24 = vpack.c.bf16 %v1685_v23, %v1684_v22  ;;  %v1703_v22 = vld [vmem:[%s3662_s1 + $0x258] sm:$0xff] }
  0x3c   : > { %1963 = vmatpush1.bf16.msra.mxu0 %v1962_v44  ;;  %v2040_v23 = vpack.c.bf16 %v1703_v22, %v1702_v20  ;;  %v854_v20 = vld [vmem:[%s3663_s2 + $0x58] sm:$0xff]  ;;  %v1714_v22 = vld [vmem:[%s3662_s1 + $0x2b0] sm:$0xff] }
  0x3d   : > { %2000 = vmatprep.subr.bf16.mxu0 %v2381_v4 }
  0x3e   : > { %1993 = vmatpush1.bf16.msra.mxu1 %v1992_v25  ;;  %v1686_v25 = vld [vmem:[%s3662_s1 + $0x1e0] sm:$0xff] }
  0x3f   : > { %1994 = vmatprep.subr.bf16.mxu1 %v2381_v4  ;;  %v2019_v27 = vpack.c.bf16 %v1687_v26, %v1686_v25  ;;  %v1705_v25 = vld [vmem:[%s3662_s1 + $0x268] sm:$0xff]  ;;  %v859_v26 = vld [vmem:[%s3663_s2 + $0x80] sm:$0xff] }
  0x42   : > { %1996 = vmatpush1.bf16.msra.mxu1 %v1995_v28  ;;  %v1688_v28 = vld [vmem:[%s3662_s1 + $0x1f0] sm:$0xff] }
  0x43   : > { %1997 = vmatprep.subr.bf16.mxu1 %v2381_v4  ;;  %v2022_v30 = vpack.c.bf16 %v1689_v29, %v1688_v28  ;;  %v843_v29 = vld [vmem:[%s3663_s2] sm:$0xff] }
  0x46   : > { %1999 = vmatpush1.bf16.msra.mxu1 %v1998_v31  ;;  %v1690_v31 = vld [vmem:[%s3662_s1 + $0x200] sm:$0xff] }
  0x47   : > { %2036 = vmatprep.subr.bf16.mxu1 %v2381_v4 }
  0x8c   : > { %v302_v50 = vpop.permute.xlu0 %301 }
  0x8d   : > { %v308_v52 = vsel %vm307_vm1, %v288_v49, %v302_v50 }
  0x8e   : > { %385 = vmatmul.mubr.f32.vlgmr.msra.gmra.mrb[0].mxu0 %v308_v52 }
  0x8f   : > { %1647 = vmatprep.mubr.msk.f32.mxu0 %vm307_vm1, %v298_v51 }
  0x90   : > { %v304_v54 = vpop.permute.xlu0 %303 }
  0x91   : > { %v309_v55 = vsel %vm307_vm1, %v283_v53, %v304_v54 }
  0x92   : > { %390 = vmatmul.mubr.f32.gmra.mrb[2].mxu0 %v309_v55 }
 0x161   : > { %v386_v37 = vpop.f32.mrb[0].mxu0 }
 0x162   : > { %v387_v38 = vadd.f32 %v386_v37, %v313_v35  ;;  %v388_v39 = vpop.f32.mrb[1].mxu0  ;;  %v1693_v37 = vld [vmem:[%s3662_s1 + $0x218] sm:$0xff] }
 0x163   : > { %v1694_v39 = vld [vmem:[%s3662_s1 + $0x220] sm:$0xff] }
 0x164   : > { %vm395_vm5 = vcmp.ge.f32.partialorder %v387_v38, 0.0  ;;  %v401_v40 = vmul.f32 %v400_v36, %v387_v38 }
 0x165   : > { %v391_v41 = vpop.f32.mrb[2].mxu0 }
 0x166   : > { %v403_v42 = vsel %vm395_vm5, %v387_v38, %v401_v40  ;;  %v392_v43 = vadd.f32 %v391_v41, %v313_v35  ;;  %v393_v44 = vpop.f32.mrb[3].mxu0  ;;  %v2025_v35 = vpack.c.bf16 %v1691_v32, %v1690_v31  ;;  %v1695_v40 = vld [vmem:[%s3662_s1 + $0x228] sm:$0xff]  ;;  %v861_v32 = vld [vmem:[%s3663_s2 + $0x90] sm:$0xff] }
 0x167   : > { %v2699_v45 = vadd.f32 %v403_v42, %v2500_v11  ;;  %v2031_v41 = vpack.c.bf16 %v1695_v40, %v1694_v39  ;;  %v1696_v42 = vld [vmem:[%s3662_s1 + $0x230] sm:$0xff]  ;;  %v846_v40 = vld [vmem:[%s3663_s2 + $0x18] sm:$0xff] }
 0x168   : > { %vm396_vm6 = vcmp.ge.f32.partialorder %v392_v43, 0.0  ;;  %v402_v46 = vmul.f32 %v400_v36, %v392_v43  ;;  %v1692_v36 = vld [vmem:[%s3662_s1 + $0x210] sm:$0xff] }
 0x169   : > { %446 = vrot.lane.b32.xlu1 %v2699_v45, %s2382_s11  ;;  %v438_v50 = vrot.slane %v2699_v45, 1  ;;  %v432_v55 = vrot.slane %v2699_v45, 7  ;;  %v2028_v38 = vpack.c.bf16 %v1693_v37, %v1692_v36  ;;  %v1706_v37 = vld [vmem:[%s3662_s1 + $0x270] sm:$0xff] }
 0x16a   : > { %v404_v48 = vsel %vm396_vm6, %v392_v43, %v402_v46  ;;  %v1697_v43 = vld [vmem:[%s3662_s1 + $0x238] sm:$0xff]  ;;  %v456_v46 = vsub.s32 1, %v2485_v7  ;;  %v845_v39 = vld [vmem:[%s3663_s2 + $0x10] sm:$0xff] }
 0x16b   : > { %v2704_v49 = vadd.f32 %v404_v48, %v2503_v12  ;;  %v2034_v44 = vpack.c.bf16 %v1697_v43, %v1696_v42  ;;  %v2078_v42 = vpack.c.bf16 %v846_v40, %v845_v39  ;;  %v863_v43 = vld [vmem:[%s3663_s2 + $0xa0] sm:$0xff]  ;;  %v600_v40 = vsub.s32 2, %v2485_v7 }
 0x16c   : > { %v457_v48 = vrot.slane %v2689_v33, %v456_v46 }
 0x16d   : > { %448 = vrot.lane.b32.xlu1 %v2704_v49, %s2382_s11  ;;  %v439_v51 = vrot.slane %v2704_v49, 1  ;;  %v433_v54 = vrot.slane %v2704_v49, 7 }
 0x16f   : > { %v440_v52 = vsel %vm292_vm0, %v438_v50, %v439_v51  ;;  %v441_v53 = vsel %vm292_vm0, %v439_v51, %v438_v50  ;;  %v435_v56 = vsel %vm282_vm2, %v433_v54, %v432_v55  ;;  %v434_v63 = vsel %vm282_vm2, %v432_v55, %v433_v54 }
 0x170   : > { %1672 = vmatprep.mubr.msk.f32.mxu1 %vm307_vm1, %v440_v52  ;;  %v436_v58 = vsel %vm286_vm3, 0.0, %v435_v56  ;;  %v443_v60 = vsel %vm296_vm4, 0.0, %v441_v53  ;;  %v544_v50 = vrot.slane %v2694_v34, %v456_v46 }
 0x1db   : > { %v447_v57 = vpop.permute.xlu1 %446 }
 0x1dc   : > { %v452_v59 = vsel %vm307_vm1, %v436_v58, %v447_v57  ;;  %v2726_v61 = vsel %vm307_vm1, %v2500_v11, %v447_v57 }
 0x1dd   : > { %529 = vmatmul.mubr.f32.vlgmr.msra.gmra.mrb[0].mxu1 %v452_v59  ;;  %v981_v2 = vrot.slane %v2726_v61, 1 }
 0x1de   : > { %1673 = vmatprep.mubr.msk.f32.mxu1 %vm307_vm1, %v443_v60 }
 0x1df   : > { %v449_v62 = vpop.permute.xlu1 %448 }
 0x1e0   : > { %v2733_v0 = vsel %vm307_vm1, %v2503_v12, %v449_v62  ;;  %v453_v1 = vsel %vm307_vm1, %v434_v63, %v449_v62  ;;  %v1674_v12 = vld [vmem:[%s3662_s1 + $0x180] sm:$0xff] }
 0x1e1   : > { %v984_v3 = vrot.slane %v2733_v0, 1  ;;  %534 = vmatmul.mubr.f32.gmra.mrb[2].mxu1 %v453_v1  ;;  %v2001_v8 = vpack.c.bf16 %v1675_v5, %v1674_v12 }
 0x1e3   : > { %v2744_v11 = vsel %vm292_vm0, %v984_v3, %v981_v2  ;;  %2002 = vmatpush1.bf16.msra.mxu0 %v2001_v8 }
 0x1e4   : > { %2003 = vmatprep.subr.bf16.mxu0 %v2381_v4 }
 0x1e7   : > { %2005 = vmatpush1.bf16.msra.mxu0 %v2004_v10 }
 0x1e8   : > { %2006 = vmatprep.subr.bf16.mxu0 %v2381_v4 }
 0x1eb   : > { %2008 = vmatpush1.bf16.msra.mxu0 %v2007_v15 }
 0x1ec   : > { %2009 = vmatprep.subr.bf16.mxu0 %v2381_v4 }
 0x1ef   : > { %2011 = vmatpush1.bf16.msra.mxu0 %v2010_v18  ;;  %v1700_v18 = vld [vmem:[%s3662_s1 + $0x240] sm:$0xff] }
 0x1f0   : > { %2012 = vmatprep.subr.bf16.mxu0 %v2381_v4 }
 0x1f3   : > { %2014 = vmatpush1.bf16.msra.mxu0 %v2013_v21  ;;  %v2037_v21 = vpack.c.bf16 %v1701_v19, %v1700_v18  ;;  %v853_v19 = vld [vmem:[%s3663_s2 + $0x50] sm:$0xff] }
 0x1f4   : > { %2015 = vmatprep.subr.bf16.mxu0 %v2381_v4 }
 0x1f5   : > { %2038 = vmatpush1.bf16.msra.mxu1 %v2037_v21 }
 0x1f6   : > { %2039 = vmatprep.subr.bf16.mxu1 %v2381_v4 }
 0x1f7   : > { %2017 = vmatpush1.bf16.msra.mxu0 %v2016_v24  ;;  %v1704_v24 = vld [vmem:[%s3662_s1 + $0x260] sm:$0xff] }
 0x1f8   : > { %2018 = vmatprep.subr.bf16.mxu0 %v2381_v4  ;;  %v2043_v36 = vpack.c.bf16 %v1705_v25, %v1704_v24  ;;  %v2094_v24 = vpack.c.bf16 %v854_v20, %v853_v19  ;;  %v891_v19 = vld [vmem:[%s3663_s2 + $0x180] sm:$0xff]  ;;  %v892_v20 = vld [vmem:[%s3663_s2 + $0x188] sm:$0xff] }
 0x1f9   : > { %2041 = vmatpush1.bf16.msra.mxu1 %v2040_v23  ;;  %v1715_v23 = vld [vmem:[%s3662_s1 + $0x2b8] sm:$0xff] }
 0x1fa   : > { %2042 = vmatprep.subr.bf16.mxu1 %v2381_v4  ;;  %v2058_v25 = vpack.c.bf16 %v1715_v23, %v1714_v22  ;;  %v875_v22 = vld [vmem:[%s3663_s2 + $0x100] sm:$0xff]  ;;  %v876_v23 = vld [vmem:[%s3663_s2 + $0x108] sm:$0xff] }
 0x1fb   : > { %2020 = vmatpush1.bf16.msra.mxu0 %v2019_v27  ;;  %v860_v27 = vld [vmem:[%s3663_s2 + $0x88] sm:$0xff] }
 0x1fc   : > { %2021 = vmatprep.subr.bf16.mxu0 %v2381_v4  ;;  %v2072_v28 = vpack.c.bf16 %v860_v27, %v859_v26  ;;  %v1716_v26 = vld [vmem:[%s3662_s1 + $0x2c0] sm:$0xff]  ;;  %v1717_v27 = vld [vmem:[%s3662_s1 + $0x2c8] sm:$0xff] }
 0x1fd   : > { %2044 = vmatpush1.bf16.msra.mxu1 %v2043_v36 }
 0x1fe   : > { %2045 = vmatprep.subr.bf16.mxu1 %v2381_v4 }
 0x1ff   : > { %2023 = vmatpush1.bf16.msra.mxu0 %v2022_v30  ;;  %v844_v30 = vld [vmem:[%s3663_s2 + $0x8] sm:$0xff] }
 0x200   : > { %2024 = vmatprep.subr.bf16.mxu0 %v2381_v4  ;;  %v2074_v31 = vpack.c.bf16 %v844_v30, %v843_v29  ;;  %v1718_v29 = vld [vmem:[%s3662_s1 + $0x2d0] sm:$0xff]  ;;  %v1719_v30 = vld [vmem:[%s3662_s1 + $0x2d8] sm:$0xff] }
 0x203   : > { %2026 = vmatpush1.bf16.msra.mxu0 %v2025_v35  ;;  %v862_v35 = vld [vmem:[%s3663_s2 + $0x98] sm:$0xff] }
 0x204   : > { %2027 = vmatprep.subr.bf16.mxu0 %v2381_v4 }
 0x207   : > { %2029 = vmatpush1.bf16.msra.mxu0 %v2028_v38  ;;  %v2076_v38 = vpack.c.bf16 %v862_v35, %v861_v32  ;;  %v1720_v32 = vld [vmem:[%s3662_s1 + $0x2e0] sm:$0xff]  ;;  %v1721_v35 = vld [vmem:[%s3662_s1 + $0x2e8] sm:$0xff] }
 0x208   : > { %2030 = vmatprep.subr.bf16.mxu0 %v2381_v4  ;;  %v2067_v36 = vpack.c.bf16 %v1721_v35, %v1720_v32  ;;  %v878_v32 = vld [vmem:[%s3663_s2 + $0x118] sm:$0xff] }
 0x20b   : > { %2032 = vmatpush1.bf16.msra.mxu0 %v2031_v41  ;;  %v1707_v41 = vld [vmem:[%s3662_s1 + $0x278] sm:$0xff] }
 0x20c   : > { %2033 = vmatprep.subr.bf16.mxu0 %v2381_v4 }
 0x20f   : > { %2035 = vmatpush1.bf16.msra.mxu0 %v2034_v44  ;;  %v864_v44 = vld [vmem:[%s3663_s2 + $0xa8] sm:$0xff] }
 0x210   : > { %2073 = vmatprep.subr.bf16.mxu0 %v2072_v28  ;;  %v2080_v46 = vpack.c.bf16 %v864_v44, %v863_v43  ;;  %v2061_v28 = vpack.c.bf16 %v1717_v27, %v1716_v26  ;;  %v855_v44 = vld [vmem:[%s3663_s2 + $0x60] sm:$0xff]  ;;  %v894_v26 = vld [vmem:[%s3663_s2 + $0x198] sm:$0xff]  ;;  %v2106_v27 = vpack.c.bf16 %v876_v23, %v875_v22  ;;  %v904_v23 = vld [vmem:[%s3663_s2 + $0x1e8] sm:$0xff] }
 0x211   : > { %v903_v22 = vld [vmem:[%s3663_s2 + $0x1e0] sm:$0xff] }
 0x2b0   : > { %v530_v51 = vpop.f32.mrb[0].mxu1 }
 0x2b1   : > { %v531_v52 = vadd.f32 %v530_v51, %v457_v48  ;;  %v532_v53 = vpop.f32.mrb[1].mxu1  ;;  %v865_v51 = vld [vmem:[%s3663_s2 + $0xb0] sm:$0xff] }
 0x2b2   : > { %v2046_v53 = vpack.c.bf16 %v1707_v41, %v1706_v37  ;;  %v1722_v37 = vld [vmem:[%s3662_s1 + $0x2f0] sm:$0xff]  ;;  %v871_v41 = vld [vmem:[%s3663_s2 + $0xe0] sm:$0xff] }
 0x2b3   : > { %vm539_vm7 = vcmp.ge.f32.partialorder %v531_v52, 0.0  ;;  %v545_v54 = vmul.f32 %v544_v50, %v531_v52 }
 0x2b4   : > { %v535_v55 = vpop.f32.mrb[2].mxu1  ;;  %2047 = vmatpush1.bf16.msra.mxu1 %v2046_v53 }
 0x2b5   : > { %v547_v56 = vsel %vm539_vm7, %v531_v52, %v545_v54  ;;  %v536_v57 = vadd.f32 %v535_v55, %v457_v48  ;;  %v537_v58 = vpop.f32.mrb[3].mxu1  ;;  %v847_v48 = vld [vmem:[%s3663_s2 + $0x20] sm:$0xff]  ;;  %v866_v52 = vld [vmem:[%s3663_s2 + $0xb8] sm:$0xff]  ;;  %v1709_v55 = vld [vmem:[%s3662_s1 + $0x288] sm:$0xff]  ;;  %2048 = vmatprep.subr.bf16.mxu1 %v2381_v4 }
 0x2b6   : > { %v2833_v59 = vadd.f32 %v547_v56, %v2699_v45  ;;  %v1708_v54 = vld [vmem:[%s3662_s1 + $0x280] sm:$0xff]  ;;  %v849_v58 = vld [vmem:[%s3663_s2 + $0x30] sm:$0xff] }
 0x2b7   : > { %vm540_vm8 = vcmp.ge.f32.partialorder %v536_v57, 0.0  ;;  %v546_v60 = vmul.f32 %v544_v50, %v536_v57  ;;  %v848_v50 = vld [vmem:[%s3663_s2 + $0x28] sm:$0xff] }
 0x2b8   : > { %590 = vrot.lane.b32.xlu0 %v2833_v59, %s2382_s11  ;;  %v582_v1 = vrot.slane %v2833_v59, 1  ;;  %v2082_v56 = vpack.c.bf16 %v848_v50, %v847_v48  ;;  %v601_v50 = vrot.slane %v2689_v33, %v600_v40 }
 0x2b9   : > { %v548_v62 = vsel %vm540_vm8, %v536_v57, %v546_v60  ;;  %v2084_v57 = vpack.c.bf16 %v866_v52, %v865_v51  ;;  %v850_v60 = vld [vmem:[%s3663_s2 + $0x38] sm:$0xff]  ;;  %v873_v51 = vld [vmem:[%s3663_s2 + $0xf0] sm:$0xff] }
 0x2ba   : > { %v2838_v63 = vadd.f32 %v548_v62, %v2704_v49  ;;  %v576_v49 = vrot.slane %v2833_v59, 7  ;;  %v867_v62 = vld [vmem:[%s3663_s2 + $0xc0] sm:$0xff]  ;;  %v874_v52 = vld [vmem:[%s3663_s2 + $0xf8] sm:$0xff] }
 0x2bb   : > { %v2100_v53 = vpack.c.bf16 %v874_v52, %v873_v51  ;;  %v897_v52 = vld [vmem:[%s3663_s2 + $0x1b0] sm:$0xff] }
 0x2bc   : > { %592 = vrot.lane.b32.xlu1 %v2838_v63, %s2382_s11  ;;  %v583_v12 = vrot.slane %v2838_v63, 1  ;;  %v577_v6 = vrot.slane %v2838_v63, 7 }
 0x2be   : > { %v584_v45 = vsel %vm292_vm0, %v582_v1, %v583_v12  ;;  %v585_v5 = vsel %vm292_vm0, %v583_v12, %v582_v1  ;;  %v579_v8 = vsel %vm282_vm2, %v577_v6, %v576_v49  ;;  %v578_v16 = vsel %vm282_vm2, %v576_v49, %v577_v6  ;;  %v868_v1 = vld [vmem:[%s3663_s2 + $0xc8] sm:$0xff] }
 0x2bf   : > { %1698 = vmatprep.mubr.msk.f32.mxu0 %vm307_vm1, %v584_v45  ;;  %v580_v10 = vsel %vm286_vm3, 0.0, %v579_v8  ;;  %v587_v14 = vsel %vm296_vm4, 0.0, %v585_v5  ;;  %v2049_v12 = vpack.c.bf16 %v1709_v55, %v1708_v54  ;;  %v1710_v45 = vld [vmem:[%s3662_s1 + $0x290] sm:$0xff]  ;;  %v1711_v5 = vld [vmem:[%s3662_s1 + $0x298] sm:$0xff]  ;;  %v2086_v6 = vpack.c.bf16 %v850_v60, %v849_v58  ;;  %v851_v8 = vld [vmem:[%s3663_s2 + $0x40] sm:$0xff] }
 0x2c0   : > { %v2088_v49 = vpack.c.bf16 %v868_v1, %v867_v62  ;;  %v857_v54 = vld [vmem:[%s3663_s2 + $0x70] sm:$0xff]  ;;  %v858_v55 = vld [vmem:[%s3663_s2 + $0x78] sm:$0xff] }
 0x2c1   : > { %2050 = vmatpush1.bf16.msra.mxu1 %v2049_v12 }
 0x2c2   : > { %2051 = vmatprep.subr.bf16.mxu1 %v2381_v4 }
 0x32a   : > { %v591_v9 = vpop.permute.xlu0 %590 }
 0x32b   : > { %v596_v13 = vsel %vm307_vm1, %v580_v10, %v591_v9  ;;  %v852_v9 = vld [vmem:[%s3663_s2 + $0x48] sm:$0xff]  ;;  %v869_v10 = vld [vmem:[%s3663_s2 + $0xd0] sm:$0xff] }
 0x32c   : > { %673 = vmatmul.mubr.f32.vlgmr.msra.gmra.mrb[4].mxu0 %v596_v13  ;;  %v870_v13 = vld [vmem:[%s3663_s2 + $0xd8] sm:$0xff] }
 0x32d   : > { %1699 = vmatprep.mubr.msk.f32.mxu0 %vm307_vm1, %v587_v14  ;;  %2075 = vmatpush3.bf16.msra.mxu0 %v2074_v31  ;;  %v2052_v14 = vpack.c.bf16 %v1711_v5, %v1710_v45  ;;  %v2092_v18 = vpack.c.bf16 %v870_v13, %v869_v10  ;;  %v2064_v31 = vpack.c.bf16 %v1719_v30, %v1718_v29 }
 0x32e   : > { %v593_v15 = vpop.permute.xlu1 %592  ;;  %2077 = vmatprep.subr.bf16.mxu0 %v2076_v38  ;;  %v1723_v38 = vld [vmem:[%s3662_s1 + $0x2f8] sm:$0xff] }
 0x32f   : > { %v597_v17 = vsel %vm307_vm1, %v578_v16, %v593_v15  ;;  %v1712_v15 = vld [vmem:[%s3662_s1 + $0x2a0] sm:$0xff]  ;;  %v1713_v16 = vld [vmem:[%s3662_s1 + $0x2a8] sm:$0xff]  ;;  %2053 = vmatpush1.bf16.msra.mxu1 %v2052_v14  ;;  %v2070_v39 = vpack.c.bf16 %v1723_v38, %v1722_v37 }
 0x330   : > { %678 = vmatmul.mubr.f32.gmra.mrb[6].mxu0 %v597_v17  ;;  %v2090_v17 = vpack.c.bf16 %v852_v9, %v851_v8  ;;  %v2055_v21 = vpack.c.bf16 %v1713_v16, %v1712_v15  ;;  %2054 = vmatprep.subr.bf16.mxu1 %v2381_v4  ;;  %v895_v37 = vld [vmem:[%s3663_s2 + $0x1a0] sm:$0xff]  ;;  %v896_v38 = vld [vmem:[%s3663_s2 + $0x1a8] sm:$0xff] }
 0x331   : > { %2079 = vmatpush3.bf16.msra.mxu0 %v2078_v42  ;;  %v872_v42 = vld [vmem:[%s3663_s2 + $0xe8] sm:$0xff] }
 0x332   : > { %2081 = vmatprep.subr.bf16.mxu0 %v2080_v46  ;;  %v2096_v43 = vpack.c.bf16 %v872_v42, %v871_v41  ;;  %v856_v46 = vld [vmem:[%s3663_s2 + $0x68] sm:$0xff] }
 0x333   : > { %2056 = vmatpush1.bf16.msra.mxu1 %v2055_v21  ;;  %v2098_v48 = vpack.c.bf16 %v856_v46, %v855_v44  ;;  %v2104_v21 = vpack.c.bf16 %v892_v20, %v891_v19  ;;  %v879_v44 = vld [vmem:[%s3663_s2 + $0x120] sm:$0xff]  ;;  %v880_v46 = vld [vmem:[%s3663_s2 + $0x128] sm:$0xff]  ;;  %v885_v19 = vld [vmem:[%s3663_s2 + $0x150] sm:$0xff] }
 0x334   : > { %2057 = vmatprep.subr.bf16.mxu1 %v2381_v4  ;;  %v886_v20 = vld [vmem:[%s3663_s2 + $0x158] sm:$0xff] }
 0x335   : > { %2083 = vmatpush3.bf16.msra.mxu0 %v2082_v56  ;;  %v688_v56 = vrot.slane %v2694_v34, %v600_v40 }
 0x336   : > { %2085 = vmatprep.subr.bf16.mxu0 %v2084_v57  ;;  %v2102_v57 = vpack.c.bf16 %v858_v55, %v857_v54 }
 0x337   : > { %2059 = vmatpush1.bf16.msra.mxu1 %v2058_v25  ;;  %v893_v25 = vld [vmem:[%s3663_s2 + $0x190] sm:$0xff] }
 0x338   : > { %2060 = vmatprep.subr.bf16.mxu1 %v2381_v4  ;;  %v2108_v30 = vpack.c.bf16 %v894_v26, %v893_v25  ;;  %v887_v25 = vld [vmem:[%s3663_s2 + $0x160] sm:$0xff]  ;;  %v888_v26 = vld [vmem:[%s3663_s2 + $0x168] sm:$0xff] }
 0x339   : > { %2087 = vmatpush3.bf16.msra.mxu0 %v2086_v6 }
 0x33a   : > { %2089 = vmatprep.subr.bf16.mxu0 %v2088_v49 }
 0x33b   : > { %2062 = vmatpush1.bf16.msra.mxu1 %v2061_v28 }
 0x33c   : > { %2063 = vmatprep.subr.bf16.mxu1 %v2381_v4 }
 0x33d   : > { %2091 = vmatpush3.bf16.msra.mxu0 %v2090_v17 }
 0x33e   : > { %2093 = vmatprep.subr.bf16.mxu0 %v2092_v18 }
 0x33f   : > { %2065 = vmatpush1.bf16.msra.mxu1 %v2064_v31  ;;  %v877_v31 = vld [vmem:[%s3663_s2 + $0x110] sm:$0xff] }
 0x340   : > { %2066 = vmatprep.subr.bf16.mxu1 %v2381_v4 }
 0x341   : > { %2095 = vmatpush3.bf16.msra.mxu0 %v2094_v24 }
 0x342   : > { %2097 = vmatprep.subr.bf16.mxu0 %v2096_v43  ;;  %v2112_v43 = vpack.c.bf16 %v896_v38, %v895_v37 }
 0x343   : > { %2068 = vmatpush1.bf16.msra.mxu1 %v2067_v36 }
 0x344   : > { %2069 = vmatprep.subr.bf16.mxu1 %v2381_v4 }
 0x345   : > { %2099 = vmatpush3.bf16.msra.mxu0 %v2098_v48  ;;  %v966_v48 = vrot.slane %v2733_v0, 7 }
 0x346   : > { %2101 = vmatprep.subr.bf16.mxu0 %v2100_v53  ;;  %v898_v53 = vld [vmem:[%s3663_s2 + $0x1b8] sm:$0xff] }
 0x347   : > { %2071 = vmatpush1.bf16.msra.mxu1 %v2070_v39 }
 0x348   : > { %2105 = vmatprep.subr.bf16.mxu1 %v2104_v21  ;;  %v2126_v21 = vpack.c.bf16 %v886_v20, %v885_v19  ;;  %v917_v19 = vld [vmem:[%s3663_s2 + $0x250] sm:$0xff]  ;;  %v918_v20 = vld [vmem:[%s3663_s2 + $0x258] sm:$0xff] }
 0x349   : > { %2103 = vmatpush3.bf16.msra.mxu0 %v2102_v57  ;;  %v2114_v57 = vpack.c.bf16 %v880_v46, %v879_v44  ;;  %v908_v44 = vld [vmem:[%s3663_s2 + $0x208] sm:$0xff]  ;;  %v925_v46 = vld [vmem:[%s3663_s2 + $0x290] sm:$0xff] }
 0x3ff   : > { %v674_v58 = vpop.f32.mrb[4].mxu0 }
 0x400   : > { %v675_v60 = vadd.f32 %v674_v58, %v601_v50  ;;  %v676_v62 = vpop.f32.mrb[5].mxu0 }
 0x401   : > { %v881_v62 = vld [vmem:[%s3663_s2 + $0x130] sm:$0xff] }
 0x402   : > { %vm683_vm9 = vcmp.ge.f32.partialorder %v675_v60, 0.0  ;;  %v689_v1 = vmul.f32 %v688_v56, %v675_v60 }
 0x403   : > { %v679_v12 = vpop.f32.mrb[6].mxu0 }
 0x404   : > { %v691_v45 = vsel %vm683_vm9, %v675_v60, %v689_v1  ;;  %v680_v5 = vadd.f32 %v679_v12, %v601_v50  ;;  %v681_v6 = vpop.f32.mrb[7].mxu0  ;;  %v2116_v60 = vpack.c.bf16 %v898_v53, %v897_v52  ;;  %v882_v1 = vld [vmem:[%s3663_s2 + $0x138] sm:$0xff]  ;;  %v909_v53 = vld [vmem:[%s3663_s2 + $0x210] sm:$0xff] }
 0x405   : > { %v3045_v49 = vadd.f32 %v691_v45, %v2833_v59 }
 0x406   : > { %vm684_vm10 = vcmp.ge.f32.partialorder %v680_v5, 0.0  ;;  %v690_v8 = vmul.f32 %v688_v56, %v680_v5 }
 0x407   : > { %734 = vrot.lane.b32.xlu0 %v3045_v49, %s2382_s11  ;;  %v726_v13 = vrot.slane %v3045_v49, 1  ;;  %v720_v18 = vrot.slane %v3045_v49, 7 }
 0x408   : > { %v692_v9 = vsel %vm684_vm10, %v680_v5, %v690_v8  ;;  %v2118_v5 = vpack.c.bf16 %v882_v1, %v881_v62  ;;  %v987_v8 = vsel %vm292_vm0, %v981_v2, %v984_v3  ;;  %v901_v3 = vld [vmem:[%s3663_s2 + $0x1d0] sm:$0xff]  ;;  %v930_v1 = vld [vmem:[%s3663_s2 + $0x2b8] sm:$0xff] }
 0x409   : > { %v3050_v10 = vadd.f32 %v692_v9, %v2838_v63  ;;  %v899_v9 = vld [vmem:[%s3663_s2 + $0x1c0] sm:$0xff]  ;;  %v929_v62 = vld [vmem:[%s3663_s2 + $0x2b0] sm:$0xff] }
 0x40b   : > { %736 = vrot.lane.b32.xlu1 %v3050_v10, %s2382_s11  ;;  %v727_v14 = vrot.slane %v3050_v10, 1  ;;  %v721_v17 = vrot.slane %v3050_v10, 7 }
 0x40d   : > { %v728_v15 = vsel %vm292_vm0, %v726_v13, %v727_v14  ;;  %v729_v16 = vsel %vm292_vm0, %v727_v14, %v726_v13  ;;  %v723_v24 = vsel %vm282_vm2, %v721_v17, %v720_v18  ;;  %v722_v42 = vsel %vm282_vm2, %v720_v18, %v721_v17  ;;  %v900_v13 = vld [vmem:[%s3663_s2 + $0x1c8] sm:$0xff]  ;;  %v902_v17 = vld [vmem:[%s3663_s2 + $0x1d8] sm:$0xff] }
 0x40e   : > { %1724 = vmatprep.mubr.msk.f32.mxu1 %vm307_vm1, %v728_v15  ;;  %v724_v29 = vsel %vm286_vm3, 0.0, %v723_v24  ;;  %v731_v39 = vsel %vm296_vm4, 0.0, %v729_v16  ;;  %v2120_v14 = vpack.c.bf16 %v900_v13, %v899_v9  ;;  %v883_v15 = vld [vmem:[%s3663_s2 + $0x140] sm:$0xff]  ;;  %v884_v16 = vld [vmem:[%s3663_s2 + $0x148] sm:$0xff]  ;;  %v2124_v18 = vpack.c.bf16 %v902_v17, %v901_v3  ;;  %v934_v3 = vld [vmem:[%s3663_s2 + $0x2d8] sm:$0xff] }
 0x40f   : > { %v2122_v2 = vpack.c.bf16 %v884_v16, %v883_v15  ;;  %v2128_v24 = vpack.c.bf16 %v904_v23, %v903_v22  ;;  %v932_v9 = vld [vmem:[%s3663_s2 + $0x2c8] sm:$0xff]  ;;  %v915_v15 = vld [vmem:[%s3663_s2 + $0x240] sm:$0xff]  ;;  %v2158_v23 = vpack.c.bf16 %v918_v20, %v917_v19 }
 0x410   : > { %v916_v16 = vld [vmem:[%s3663_s2 + $0x248] sm:$0xff] }
 0x411   : > { %v2154_v17 = vpack.c.bf16 %v916_v16, %v915_v15  ;;  %v936_v22 = vld [vmem:[%s3663_s2 + $0x2e8] sm:$0xff] }
 0x479   : > { %v735_v28 = vpop.permute.xlu0 %734 }
 0x47a   : > { %v740_v35 = vsel %vm307_vm1, %v724_v29, %v735_v28  ;;  %v3094_v36 = vsel %vm307_vm1, %v2833_v59, %v735_v28  ;;  %v2110_v59 = vpack.c.bf16 %v878_v32, %v877_v31  ;;  %v905_v28 = vld [vmem:[%s3663_s2 + $0x1f0] sm:$0xff]  ;;  %v906_v29 = vld [vmem:[%s3663_s2 + $0x1f8] sm:$0xff] }
 0x47b   : > { %817 = vmatmul.mubr.f32.vlgmr.msra.gmra.mrb[4].mxu1 %v740_v35  ;;  %v2295_v40 = vpack.i.bf16 %v3094_v36, %v2726_v61  ;;  %v964_v54 = vrot.slane %v3094_v36, 7  ;;  %v889_v31 = vld [vmem:[%s3663_s2 + $0x170] sm:$0xff]  ;;  %v890_v32 = vld [vmem:[%s3663_s2 + $0x178] sm:$0xff] }
 0x47c   : > { %1725 = vmatprep.mubr.msk.f32.mxu1 %vm307_vm1, %v731_v39  ;;  %2107 = vmatpush3.bf16.msra.mxu1 %v2106_v27  ;;  %v2130_v27 = vpack.c.bf16 %v888_v26, %v887_v25  ;;  %v2134_v35 = vpack.c.bf16 %v890_v32, %v889_v31  ;;  %v919_v25 = vld [vmem:[%s3663_s2 + $0x260] sm:$0xff]  ;;  %v920_v26 = vld [vmem:[%s3663_s2 + $0x268] sm:$0xff]  ;;  %v921_v31 = vld [vmem:[%s3663_s2 + $0x270] sm:$0xff] }
 0x47d   : > { %2296 = vrot.lane.b32.xlu0 %v2295_v40, %s2382_s11  ;;  %v737_v41 = vpop.permute.xlu1 %736  ;;  %2109 = vmatprep.subr.bf16.mxu1 %v2108_v30  ;;  %v2132_v30 = vpack.c.bf16 %v906_v29, %v905_v28  ;;  %v938_v28 = vld [vmem:[%s3663_s2 + $0x2f8] sm:$0xff]  ;;  %v2162_v29 = vpack.c.bf16 %v920_v26, %v919_v25 }
 0x47e   : > { %v3119_v50 = vsel %vm307_vm1, %v2838_v63, %v737_v41  ;;  %v741_v51 = vsel %vm307_vm1, %v722_v42, %v737_v41  ;;  %v963_v63 = vrot.slane %v2726_v61, 7  ;;  %v924_v41 = vld [vmem:[%s3663_s2 + $0x288] sm:$0xff]  ;;  %v907_v42 = vld [vmem:[%s3663_s2 + $0x200] sm:$0xff]  ;;  %v922_v32 = vld [vmem:[%s3663_s2 + $0x278] sm:$0xff] }
 0x47f   : > { %v967_v55 = vrot.slane %v3119_v50, 7  ;;  %822 = vmatmul.mubr.f32.gmra.mrb[6].mxu1 %v741_v51  ;;  %v2300_v56 = vpack.i.bf16 %v3119_v50, %v2733_v0  ;;  %v2138_v51 = vpack.c.bf16 %v908_v44, %v907_v42 }
 0x480   : > { %2111 = vmatpush3.bf16.msra.mxu1 %v2110_v59  ;;  %v972_v12 = vsel %vm282_vm2, %v966_v48, %v963_v63  ;;  %v969_v6 = vsel %vm282_vm2, %v963_v63, %v966_v48  ;;  %v923_v59 = vld [vmem:[%s3663_s2 + $0x280] sm:$0xff]  ;;  %v926_v48 = vld [vmem:[%s3663_s2 + $0x298] sm:$0xff] }
 0x481   : > { %2301 = vrot.lane.b32.xlu0 %v2300_v56, %s2382_s11  ;;  %v973_v58 = vsel %vm282_vm2, %v967_v55, %v964_v54  ;;  %2113 = vmatprep.subr.bf16.mxu1 %v2112_v43  ;;  %v970_v45 = vsel %vm282_vm2, %v964_v54, %v967_v55  ;;  %v2136_v43 = vpack.c.bf16 %v924_v41, %v923_v59  ;;  %v910_v54 = vld [vmem:[%s3663_s2 + $0x218] sm:$0xff]  ;;  %v927_v55 = vld [vmem:[%s3663_s2 + $0x2a0] sm:$0xff]  ;;  %v928_v56 = vld [vmem:[%s3663_s2 + $0x2a8] sm:$0xff] }
 0x482   : > { %1727 = vmatprep.mubr.msk.f32.mxu0 %vm1726_vm11, %v973_v58  ;;  %v2140_v52 = vpack.c.bf16 %v926_v48, %v925_v46  ;;  %v2142_v63 = vpack.c.bf16 %v910_v54, %v909_v53  ;;  %v911_v58 = vld [vmem:[%s3663_s2 + $0x220] sm:$0xff]  ;;  %v1366_v41 = vld [vmem:[%s3664_s3 + $0x88] sm:$0xff] }
 0x483   : > { %1729 = vmatmul.mubr.msk.f32.vlgmr.msra.gmra.mrb[8].mxu0 %vm1726_vm11, %v972_v12  ;;  %2137 = vmatprep.subr.bf16.mxu0 %v2136_v43  ;;  %v1365_v59 = vld [vmem:[%s3664_s3 + $0x80] sm:$0xff] }
 0x484   : > { %1108 = vmatprep.mubr.f32.mxu0 %v970_v45  ;;  %2115 = vmatpush3.bf16.msra.mxu1 %v2114_v57  ;;  %v2144_v57 = vpack.c.bf16 %v928_v56, %v927_v55  ;;  %v2148_v45 = vpack.c.bf16 %v930_v1, %v929_v62  ;;  %v2204_v42 = vpack.c.bf16 %v1366_v41, %v1365_v59  ;;  %v951_v41 = vld [vmem:[%s3663_s2 + $0x360] sm:$0xff] }
 0x485   : > { %2117 = vmatprep.subr.bf16.mxu1 %v2116_v60  ;;  %2139 = vmatpush3.bf16.msra.mxu0 %v2138_v51  ;;  %v912_v60 = vld [vmem:[%s3663_s2 + $0x228] sm:$0xff] }
 0x486   : > { %2141 = vmatprep.subr.bf16.mxu0 %v2140_v52  ;;  %v2146_v12 = vpack.c.bf16 %v912_v60, %v911_v58 }
 0x487   : > { %1109 = vmatmul.mubr.f32.gmra.mrb[10].mxu0 %v969_v6  ;;  %v914_v6 = vld [vmem:[%s3663_s2 + $0x238] sm:$0xff] }
 0x488   : > { %1253 = vmatprep.mubr.f32.mxu0 %v987_v8  ;;  %2119 = vmatpush3.bf16.msra.mxu1 %v2118_v5  ;;  %v913_v5 = vld [vmem:[%s3663_s2 + $0x230] sm:$0xff]  ;;  %v931_v8 = vld [vmem:[%s3663_s2 + $0x2c0] sm:$0xff] }
 0x489   : > { %2121 = vmatprep.subr.bf16.mxu1 %v2120_v14  ;;  %2143 = vmatpush3.bf16.msra.mxu0 %v2142_v63  ;;  %v2150_v13 = vpack.c.bf16 %v914_v6, %v913_v5  ;;  %v2152_v14 = vpack.c.bf16 %v932_v9, %v931_v8 }
 0x48a   : > { %2145 = vmatprep.subr.bf16.mxu0 %v2144_v57 }
 0x48c   : > { %2123 = vmatpush3.bf16.msra.mxu1 %v2122_v2  ;;  %v933_v2 = vld [vmem:[%s3663_s2 + $0x2d0] sm:$0xff] }
 0x48d   : > { %2125 = vmatprep.subr.bf16.mxu1 %v2124_v18  ;;  %2147 = vmatpush3.bf16.msra.mxu0 %v2146_v12  ;;  %v2156_v18 = vpack.c.bf16 %v934_v3, %v933_v2  ;;  %v940_v12 = vld [vmem:[%s3663_s2 + $0x308] sm:$0xff]  ;;  %v941_v2 = vld [vmem:[%s3663_s2 + $0x310] sm:$0xff]  ;;  %v942_v3 = vld [vmem:[%s3663_s2 + $0x318] sm:$0xff] }
 0x48e   : > { %2149 = vmatprep.subr.bf16.mxu0 %v2148_v45 }
 0x490   : > { %2127 = vmatpush3.bf16.msra.mxu1 %v2126_v21  ;;  %v935_v21 = vld [vmem:[%s3663_s2 + $0x2e0] sm:$0xff] }
 0x491   : > { %2129 = vmatprep.subr.bf16.mxu1 %v2128_v24  ;;  %2151 = vmatpush3.bf16.msra.mxu0 %v2150_v13  ;;  %v2160_v24 = vpack.c.bf16 %v936_v22, %v935_v21  ;;  %v2172_v21 = vpack.c.bf16 %v942_v3, %v941_v2  ;;  %v1385_v3 = vld [vmem:[%s3664_s3 + $0x120] sm:$0xff] }
 0x492   : > { %2153 = vmatprep.subr.bf16.mxu0 %v2152_v14 }
 0x494   : > { %2131 = vmatpush3.bf16.msra.mxu1 %v2130_v27  ;;  %v937_v27 = vld [vmem:[%s3663_s2 + $0x2f0] sm:$0xff] }
 0x495   : > { %2133 = vmatprep.subr.bf16.mxu1 %v2132_v30  ;;  %2155 = vmatpush3.bf16.msra.mxu0 %v2154_v17  ;;  %v2164_v30 = vpack.c.bf16 %v938_v28, %v937_v27  ;;  %v945_v27 = vld [vmem:[%s3663_s2 + $0x330] sm:$0xff]  ;;  %v946_v28 = vld [vmem:[%s3663_s2 + $0x338] sm:$0xff] }
 0x496   : > { %2157 = vmatprep.subr.bf16.mxu0 %v2156_v18 }
 0x498   : > { %2135 = vmatpush3.bf16.msra.mxu1 %v2134_v35  ;;  %v2166_v35 = vpack.c.bf16 %v922_v32, %v921_v31  ;;  %v948_v31 = vld [vmem:[%s3663_s2 + $0x348] sm:$0xff] }
 0x499   : > { %2168 = vmatprep.subr.bf16.mxu1 %v2381_v4  ;;  %2159 = vmatpush3.bf16.msra.mxu0 %v2158_v23  ;;  %v944_v23 = vld [vmem:[%s3663_s2 + $0x328] sm:$0xff] }
 0x49a   : > { %2161 = vmatprep.subr.bf16.mxu0 %v2160_v24 }
 0x49d   : > { %2163 = vmatpush3.bf16.msra.mxu0 %v2162_v29  ;;  %v2178_v29 = vpack.c.bf16 %v946_v28, %v945_v27 }
 0x49e   : > { %2165 = vmatprep.subr.bf16.mxu0 %v2164_v30  ;;  %v947_v30 = vld [vmem:[%s3663_s2 + $0x340] sm:$0xff] }
 0x49f   : > { %v2181_v32 = vpack.c.bf16 %v948_v31, %v947_v30  ;;  %v1369_v31 = vld [vmem:[%s3664_s3 + $0xa0] sm:$0xff] }
 0x4a1   : > { %2167 = vmatpush3.bf16.msra.mxu0 %v2166_v35  ;;  %v949_v35 = vld [vmem:[%s3663_s2 + $0x350] sm:$0xff] }
 0x4a2   : > { %2205 = vmatprep.subr.bf16.mxu0 %v2204_v42  ;;  %v952_v42 = vld [vmem:[%s3663_s2 + $0x368] sm:$0xff] }
 0x4ef   : > { %v3205_v37 = vpop.permute.xlu0 %2296 }
 0x4f0   : > { %v2299_v38 = vunpack.i.h.bf16 %v3205_v37  ;;  %v2298_v39 = vunpack.i.l.bf16 %v3205_v37 }
 0x4f2   : > { %v1017_v40 = vsel %vm307_vm1, %v2298_v39, %v2299_v38 }
 0x4f3   : > { %1178 = vmatprep.mubr.f32.mxu1 %v1017_v40  ;;  %v744_v40 = vsub.s32 3, %v2485_v7  ;;  %v3324_v60 = vpop.permute.xlu0 %2301 }
 0x4f4   : > { %v2303_v8 = vunpack.i.l.bf16 %v3324_v60 }
 0x4f5   : > { %v745_v43 = vrot.slane %v2689_v33, %v744_v40  ;;  %v832_v44 = vrot.slane %v2694_v34, %v744_v40  ;;  %v950_v40 = vld [vmem:[%s3663_s2 + $0x358] sm:$0xff] }
 0x4f6   : > { %v2184_v59 = vpack.c.bf16 %v950_v40, %v949_v35 }
 0x54e   : > { %v818_v46 = vpop.f32.mrb[4].mxu1 }
 0x54f   : > { %v819_v48 = vadd.f32 %v818_v46, %v745_v43  ;;  %v820_v51 = vpop.f32.mrb[5].mxu1  ;;  %v954_v46 = vld [vmem:[%s3663_s2 + $0x378] sm:$0xff] }
 0x550   : > { %v955_v51 = vld [vmem:[%s3663_s2 + $0x380] sm:$0xff] }
 0x551   : > { %vm827_vm12 = vcmp.ge.f32.partialorder %v819_v48, 0.0  ;;  %v833_v52 = vmul.f32 %v832_v44, %v819_v48 }
 0x552   : > { %v823_v53 = vpop.f32.mrb[6].mxu1 }
 0x553   : > { %v835_v54 = vsel %vm827_vm12, %v819_v48, %v833_v52  ;;  %v824_v55 = vadd.f32 %v823_v53, %v745_v43  ;;  %v825_v56 = vpop.f32.mrb[7].mxu1  ;;  %v2187_v43 = vpack.c.bf16 %v952_v42, %v951_v41  ;;  %v956_v52 = vld [vmem:[%s3663_s2 + $0x388] sm:$0xff]  ;;  %v1372_v42 = vld [vmem:[%s3664_s3 + $0xb8] sm:$0xff] }
 0x554   : > { %v3320_v63 = vadd.f32 %v835_v54, %v3045_v49  ;;  %v939_v49 = vld [vmem:[%s3663_s2 + $0x300] sm:$0xff]  ;;  %v2193_v53 = vpack.c.bf16 %v956_v52, %v955_v51  ;;  %v957_v54 = vld [vmem:[%s3663_s2 + $0x390] sm:$0xff] }
 0x555   : > { %vm828_vm13 = vcmp.ge.f32.partialorder %v824_v55, 0.0  ;;  %v834_v57 = vmul.f32 %v832_v44, %v824_v55  ;;  %v2169_v15 = vpack.c.bf16 %v940_v12, %v939_v49  ;;  %v953_v44 = vld [vmem:[%s3663_s2 + $0x370] sm:$0xff]  ;;  %v962_v49 = vld [vmem:[%s3663_s2 + $0x3b8] sm:$0xff]  ;;  %v1381_v12 = vld [vmem:[%s3664_s3 + $0x100] sm:$0xff] }
 0x556   : > { %v1779_v58 = vpop.f32.mrb[8].mxu0  ;;  %1009 = vrot.lane.b32.xlu1 %v3320_v63, %s2382_s11  ;;  %v965_v5 = vrot.slane %v3320_v63, 7  ;;  %v983_v22 = vrot.slane %v3320_v63, 1  ;;  %v2190_v48 = vpack.c.bf16 %v954_v46, %v953_v44  ;;  %v1373_v46 = vld [vmem:[%s3664_s3 + $0xc0] sm:$0xff] }
 0x557   : > { %v836_v33 = vsel %vm828_vm13, %v824_v55, %v834_v57  ;;  %v1780_v34 = vpop.f32.mrb[9].mxu0  ;;  %v958_v55 = vld [vmem:[%s3663_s2 + $0x398] sm:$0xff]  ;;  %v959_v57 = vld [vmem:[%s3663_s2 + $0x3a0] sm:$0xff] }
 0x558   : > { %v3327_v62 = vadd.f32 %v836_v33, %v3050_v10  ;;  %v3329_v1 = vadd.f32 %v1780_v34, %v1779_v58  ;;  %v2304_v10 = vunpack.i.h.bf16 %v3324_v60  ;;  %v2196_v56 = vpack.c.bf16 %v958_v55, %v957_v54  ;;  %v960_v58 = vld [vmem:[%s3663_s2 + $0x3a8] sm:$0xff]  ;;  %v961_v34 = vld [vmem:[%s3663_s2 + $0x3b0] sm:$0xff]  ;;  %v1357_v52 = vld [vmem:[%s3664_s3 + $0x40] sm:$0xff] }
 0x559   : > { %v2199_v33 = vpack.c.bf16 %v960_v58, %v959_v57  ;;  %v1355_v60 = vld [vmem:[%s3664_s3 + $0x30] sm:$0xff]  ;;  %v1376_v55 = vld [vmem:[%s3664_s3 + $0xd8] sm:$0xff] }
 0x55a   : > { %v1782_v45 = vpop.f32.mrb[10].mxu0  ;;  %1015 = vrot.lane.b32.xlu1 %v3327_v62, %s2382_s11  ;;  %v968_v6 = vrot.slane %v3327_v62, 7  ;;  %v1019_v18 = vsel %vm307_vm1, %v2303_v8, %v2304_v10  ;;  %v986_v20 = vrot.slane %v3327_v62, 1  ;;  %v1375_v54 = vld [vmem:[%s3664_s3 + $0xd0] sm:$0xff]  ;;  %s244_s11 = scalar_lea.vmem [#allocation2], %s1643_s18 }
 0x55b   : > { %v1783_v9 = vpop.f32.mrb[11].mxu0  ;;  %v2224_v57 = vpack.c.bf16 %v1376_v55, %v1375_v54  ;;  %v1359_v58 = vld [vmem:[%s3664_s3 + $0x50] sm:$0xff]  ;;  %s1577_s20 = sshll.u32 %s244_s11, 4  ;;  %s3616_s20 = int_to_ptr.vmem [resolvable:$true] %s1577_s20 }
 0x55c   : > { %v3343_v13 = vadd.f32 %v1783_v9, %v1782_v45  ;;  %v974_v14 = vsel %vm282_vm2, %v968_v6, %v965_v5  ;;  %v971_v19 = vsel %vm282_vm2, %v965_v5, %v968_v6  ;;  %v989_v25 = vsel %vm292_vm0, %v983_v22, %v986_v20  ;;  %v1382_v45 = vld [vmem:[%s3664_s3 + $0x108] sm:$0xff]  ;;  %v1383_v9 = vld [vmem:[%s3664_s3 + $0x110] sm:$0xff]  ;;  %s2317_s9 = scalar_lea.vmem %s3616_s20, 256  ;;  %p2324_p0 = scmp.lt.s32.totalorder %s3616_s20, %s2322_s13 }
 0x55d   : > { %v977_v16 = vsel %vm286_vm3, 0.0, %v974_v14  ;;  %v1028_v24 = vsel %vm307_vm1, %v971_v19, %v2303_v8  ;;  %v2202_v5 = vpack.c.bf16 %v962_v49, %v961_v34  ;;  %v2236_v6 = vpack.c.bf16 %v1382_v45, %v1381_v12  ;;  %v1384_v14 = vld [vmem:[%s3664_s3 + $0x118] sm:$0xff]  ;;  %v1377_v34 = vld [vmem:[%s3664_s3 + $0xe0] sm:$0xff]  ;;  %v1378_v49 = vld [vmem:[%s3664_s3 + $0xe8] sm:$0xff]  ;;  %p2318_p11 = scmp.ne.s32.totalorder %s3616_s20, %s2317_s9  ;;  %p2325_p1 = scmp.lt.s32.totalorder %s2323_s14, %s2317_s9 }
 0x55e   : > { %v1027_v17 = vsel %vm307_vm1, %v977_v16, %v2298_v39  ;;  %v943_v39 = vld [vmem:[%s3663_s2 + $0x320] sm:$0xff]  ;;  %v985_v8 = vrot.slane %v3119_v50, 1  ;;  %v2240_v16 = vpack.c.bf16 %v1384_v14, %v1383_v9  ;;  %v2228_v45 = vpack.c.bf16 %v1378_v49, %v1377_v34  ;;  %v1380_v9 = vld [vmem:[%s3664_s3 + $0xf8] sm:$0xff] }
 0x55f   : > { %1179 = vmatmul.mubr.f32.vlgmr.msra.gmra.mrb[8].mxu1 %v1027_v17  ;;  %v2175_v26 = vpack.c.bf16 %v944_v23, %v943_v39  ;;  %v1386_v17 = vld [vmem:[%s3664_s3 + $0x128] sm:$0xff]  ;;  %v1388_v39 = vld [vmem:[%s3664_s3 + $0x138] sm:$0xff]  ;;  %v1349_v23 = vld [vmem:[%s3664_s3] sm:$0xff]  ;;  %p2319_p12 = pnand %p2318_p11, %p2459_p5  ;;  %p2326_p2 = por %p2325_p1, %p2324_p0 }
 0x560   : > { %2170 = vmatpush1.bf16.msra.mxu1 %v2169_v15  ;;  %1183 = vmatprep.mubr.f32.mxu1 %v1019_v18  ;;  %v982_v15 = vrot.slane %v3094_v36, 1  ;;  %v2315_v49 = vld [vmem:[%s2497_s10] sm:$0xff] }
 0x561   : > { %2171 = vmatprep.subr.bf16.mxu1 %v2381_v4  ;;  %p2320_p13 = pneg %p2319_p12 }
 0x562   : > { %v988_v2 = vsel %vm292_vm0, %v982_v15, %v985_v8 }
 0x563   : > { %1184 = vmatmul.mubr.f32.gmra.mrb[10].mxu1 %v1028_v24  ;;  %v1350_v24 = vld [vmem:[%s3664_s3 + $0x8] sm:$0xff]  ;;  %p2327_p3 = pnand %p2326_p2, %p2320_p13 }
 0x564   : > { %2173 = vmatpush1.bf16.msra.mxu1 %v2172_v21  ;;  %1732 = vmatprep.mubr.msk.f32.mxu1 %vm307_vm1, %v989_v25  ;;  %v991_v21 = vsel %vm292_vm0, %v985_v8, %v982_v15  ;;  %v1368_v25 = vld [vmem:[%s3664_s3 + $0x98] sm:$0xff]  ;;  %v1379_v8 = vld [vmem:[%s3664_s3 + $0xf0] sm:$0xff] }
 0x565   : > { %2174 = vmatprep.subr.bf16.mxu1 %v2381_v4  ;;  %v2232_v15 = vpack.c.bf16 %v1380_v9, %v1379_v8 }
 0x568   : > { %2176 = vmatpush1.bf16.msra.mxu1 %v2175_v26  ;;  %v2206_v26 = vpack.c.bf16 %v1350_v24, %v1349_v23 }
 0x569   : > { %2177 = vmatprep.subr.bf16.mxu1 %v2381_v4 }
 0x56c   : > { %2179 = vmatpush1.bf16.msra.mxu1 %v2178_v29  ;;  %v1352_v29 = vld [vmem:[%s3664_s3 + $0x18] sm:$0xff] }
 0x56d   : > { %2180 = vmatprep.subr.bf16.mxu1 %v2381_v4 }
 0x570   : > { %2182 = vmatpush1.bf16.msra.mxu1 %v2181_v32  ;;  %v1370_v32 = vld [vmem:[%s3664_s3 + $0xa8] sm:$0xff] }
 0x571   : > { %2183 = vmatprep.subr.bf16.mxu1 %v2381_v4  ;;  %v2212_v37 = vpack.c.bf16 %v1370_v32, %v1369_v31 }
 0x574   : > { %2185 = vmatpush1.bf16.msra.mxu1 %v2184_v59  ;;  %v1354_v59 = vld [vmem:[%s3664_s3 + $0x28] sm:$0xff] }
 0x575   : > { %2186 = vmatprep.subr.bf16.mxu1 %v2381_v4 }
 0x578   : > { %2188 = vmatpush1.bf16.msra.mxu1 %v2187_v43 }
 0x579   : > { %2189 = vmatprep.subr.bf16.mxu1 %v2381_v4 }
 0x57c   : > { %2191 = vmatpush1.bf16.msra.mxu1 %v2190_v48  ;;  %v1374_v48 = vld [vmem:[%s3664_s3 + $0xc8] sm:$0xff] }
 0x57d   : > { %2192 = vmatprep.subr.bf16.mxu1 %v2381_v4  ;;  %v2220_v51 = vpack.c.bf16 %v1374_v48, %v1373_v46 }
 0x580   : > { %2194 = vmatpush1.bf16.msra.mxu1 %v2193_v53  ;;  %v1358_v53 = vld [vmem:[%s3664_s3 + $0x48] sm:$0xff] }
 0x581   : > { %2195 = vmatprep.subr.bf16.mxu1 %v2381_v4 }
 0x584   : > { %2197 = vmatpush1.bf16.msra.mxu1 %v2196_v56  ;;  %v2222_v56 = vpack.c.bf16 %v1358_v53, %v1357_v52 }
 0x585   : > { %2198 = vmatprep.subr.bf16.mxu1 %v2381_v4 }
 0x588   : > { %2200 = vmatpush1.bf16.msra.mxu1 %v2199_v33  ;;  %v1360_v33 = vld [vmem:[%s3664_s3 + $0x58] sm:$0xff] }
 0x589   : > { %2201 = vmatprep.subr.bf16.mxu1 %v2381_v4  ;;  %v992_v4 = vsel %vm292_vm0, %v986_v20, %v983_v22  ;;  %v2244_v20 = vpack.c.bf16 %v1386_v17, %v1385_v3  ;;  %v1387_v22 = vld [vmem:[%s3664_s3 + $0x130] sm:$0xff]  ;;  %v2226_v12 = vpack.c.bf16 %v1360_v33, %v1359_v58  ;;  %v1031_v3 = vsub.s32 4, %v2485_v7  ;;  %v2313_v17 = vld [vmem:[%s3665_s4] sm:$0x1f] }
 0x58a   : > { %v998_v18 = vsel %vm296_vm4, 0.0, %v992_v4  ;;  %v2248_v47 = vpack.c.bf16 %v1388_v39, %v1387_v22  ;;  %v1363_v4 = vld [vmem:[%s3664_s3 + $0x70] sm:$0xff] }
 0x58c   : > { %2203 = vmatpush1.bf16.msra.mxu1 %v2202_v5  ;;  %v1361_v5 = vld [vmem:[%s3664_s3 + $0x60] sm:$0xff] }
 0x58d   : > { %2237 = vmatprep.subr.bf16.mxu1 %v2236_v6 }
 0x58f   : > { %1329 = vmatmul.mubr.f32.vlgmr.msra.gmra.mrb[12].mxu1 %v988_v2 }
 0x590   : > { %1733 = vmatprep.mubr.msk.f32.mxu1 %vm307_vm1, %v998_v18  ;;  %2239 = vmatpush3.bf16.msra.mxu1 %v2236_v6  ;;  %v1362_v6 = vld [vmem:[%s3664_s3 + $0x68] sm:$0xff]  ;;  %v1032_v18 = vrot.slane %v2313_v17, %v1031_v3 }
 0x591   : > { %2241 = vmatprep.subr.bf16.mxu1 %v2240_v16  ;;  %v2230_v14 = vpack.c.bf16 %v1362_v6, %v1361_v5  ;;  %v2316_v5 = vld [vmem:[%s2497_s10 + $0x8] sm:$0xff] }
 0x593   : > { %1735 = vmatmul.mubr.msk.f32.gmra.mrb[14].mxu1 %vm3477_vm14, %v991_v21  ;;  %v1106_v21 = vadd.f32 %v3329_v1, %v1032_v18 }
 0x594   : > { %2243 = vmatpush3.bf16.msra.mxu1 %v2240_v16  ;;  %1925 = vmatprep.mubr.msk.f32.mxu1 %vm307_vm1, %v3320_v63  ;;  %v1367_v63 = vld [vmem:[%s3664_s3 + $0x90] sm:$0xff]  ;;  %v1364_v16 = vld [vmem:[%s3664_s3 + $0x78] sm:$0xff] }
 0x595   : > { %2245 = vmatprep.subr.bf16.mxu1 %v2244_v20  ;;  %v2208_v28 = vpack.c.bf16 %v1368_v25, %v1367_v63  ;;  %v2234_v2 = vpack.c.bf16 %v1364_v16, %v1363_v4 }
 0x598   : > { %2247 = vmatpush3.bf16.msra.mxu1 %v2244_v20 }
 0x599   : > { %2249 = vmatprep.subr.bf16.mxu1 %v2248_v47 }
 0x59c   : > { %2251 = vmatpush3.bf16.msra.mxu1 %v2248_v47 }
 0x59f   : > { %1926 = vmatmul.mubr.msk.f32.vlgmr.msra.gmra.mrb[16].mxu1 %vm307_vm1, %v3327_v62  ;;  %v1351_v62 = vld [vmem:[%s3664_s3 + $0x10] sm:$0xff] }
 0x5a0   : > { %v2210_v35 = vpack.c.bf16 %v1352_v29, %v1351_v62 }
 0x5c8   : > { %v1010_v27 = vpop.permute.xlu1 %1009 }
 0x5c9   : > { %v1018_v30 = vsel %vm307_vm1, %v2299_v38, %v1010_v27  ;;  %v1353_v38 = vld [vmem:[%s3664_s3 + $0x20] sm:$0xff] }
 0x5ca   : > { %1254 = vmatmul.mubr.f32.vlgmr.msra.gmra.mrb[12].mxu0 %v1018_v30  ;;  %v2214_v43 = vpack.c.bf16 %v1354_v59, %v1353_v38 }
 0x5cb   : > { %2207 = vmatpush3.bf16.msra.mxu0 %v2206_v26  ;;  %1731 = vmatprep.mubr.msk.f32.mxu0 %vm3477_vm14, %v2744_v11  ;;  %v1371_v11 = vld [vmem:[%s3664_s3 + $0xb0] sm:$0xff] }
 0x5cc   : > { %v1016_v40 = vpop.permute.xlu1 %1015  ;;  %2209 = vmatprep.subr.bf16.mxu0 %v2208_v28  ;;  %v2216_v44 = vpack.c.bf16 %v1372_v42, %v1371_v11 }
 0x5cd   : > { %v1020_v41 = vsel %vm307_vm1, %v2304_v10, %v1016_v40  ;;  %v1356_v10 = vld [vmem:[%s3664_s3 + $0x38] sm:$0xff] }
 0x5ce   : > { %1259 = vmatmul.mubr.f32.gmra.mrb[14].mxu0 %v1020_v41 }
 0x5cf   : > { %2211 = vmatpush3.bf16.msra.mxu0 %v2210_v35  ;;  %1457 = vmatprep.mubr.f32.mxu0 %v3094_v36  ;;  %v2218_v36 = vpack.c.bf16 %v1356_v10, %v1355_v60 }
 0x5d0   : > { %2213 = vmatprep.subr.bf16.mxu0 %v2212_v37 }
 0x5d3   : > { %2215 = vmatpush3.bf16.msra.mxu0 %v2214_v43 }
 0x5d4   : > { %2217 = vmatprep.subr.bf16.mxu0 %v2216_v44 }
 0x5d7   : > { %2219 = vmatpush3.bf16.msra.mxu0 %v2218_v36 }
 0x5d8   : > { %2221 = vmatprep.subr.bf16.mxu0 %v2220_v51 }
 0x5db   : > { %2223 = vmatpush3.bf16.msra.mxu0 %v2222_v56 }
 0x5dc   : > { %2225 = vmatprep.subr.bf16.mxu0 %v2224_v57 }
 0x5df   : > { %2227 = vmatpush3.bf16.msra.mxu0 %v2226_v12 }
 0x5e0   : > { %2229 = vmatprep.subr.bf16.mxu0 %v2228_v45 }
 0x5e3   : > { %2231 = vmatpush3.bf16.msra.mxu0 %v2230_v14 }
 0x5e4   : > { %2233 = vmatprep.subr.bf16.mxu0 %v2232_v15 }
 0x5e7   : > { %2235 = vmatpush3.bf16.msra.mxu0 %v2234_v2 }
 0x5ea   : > { %1458 = vmatmul.mubr.f32.vlgmr.msra.gmra.mrb[16].mxu0 %v2726_v61  ;;  %v1111_v61 = vadd.f32 %v3343_v13, %v1032_v18  ;;  %v2314_v13 = vld [vmem:[%s3666_s5] sm:$0x1f] }
 0x5eb   : > { %1462 = vmatprep.mubr.f32.mxu0 %v3119_v50  ;;  %v1344_v38 = vrot.slane %v2314_v13, %v1031_v3 }
 0x5ee   : > { %1463 = vmatmul.mubr.f32.gmra.mrb[18].mxu0 %v2733_v0 }
 0x632   : > { %v1817_v19 = vpop.f32.mrb[8].mxu1 }
 0x633   : > { %v1818_v20 = vpop.f32.mrb[9].mxu1 }
 0x634   : > { %v1819_v22 = vadd.f32 %v1818_v20, %v1817_v19 }
 0x636   : > { %v1181_v39 = vadd.f32 %v1819_v22, %v1106_v21  ;;  %v1820_v47 = vpop.f32.mrb[10].mxu1 }
 0x637   : > { %v1821_v23 = vpop.f32.mrb[11].mxu1 }
 0x638   : > { %v1822_v50 = vadd.f32 %v1821_v23, %v1820_v47 }
 0x63a   : > { %v1186_v24 = vadd.f32 %v1822_v50, %v1111_v61 }
 0x662   : > { %v1330_v0 = vpop.f32.mrb[12].mxu1 }
 0x663   : > { %v1332_v63 = vpop.f32.mrb[13].mxu1 }
 0x666   : > { %v1335_v7 = vpop.f32.mrb[14].mxu1 }
 0x667   : > { %v1337_v25 = vpop.f32.mrb[15].mxu1 }
 0x672   : > { %v1927_v26 = vpop.f32.mrb[16].mxu1 }
 0x673   : > { %v1534_v27 = vpop.f32.mrb[17].mxu1 }
 0x69d   : > { %v1855_v28 = vpop.f32.mrb[12].mxu0 }
 0x69e   : > { %v1856_v62 = vpop.f32.mrb[13].mxu0 }
 0x69f   : > { %v1857_v29 = vadd.f32 %v1856_v62, %v1855_v28 }
 0x6a1   : > { %v1256_v30 = vadd.f32 %v1857_v29, %v1181_v39  ;;  %v1858_v31 = vpop.f32.mrb[14].mxu0 }
 0x6a2   : > { %v1859_v1 = vpop.f32.mrb[15].mxu0 }
 0x6a3   : > { %v1331_v32 = vadd.f32 %v1330_v0, %v1256_v30  ;;  %v1860_v35 = vadd.f32 %v1859_v1, %v1858_v31 }
 0x6a5   : > { %v1261_v40 = vadd.f32 %v1860_v35, %v1186_v24  ;;  %v1345_v41 = vmul.f32 %v1344_v38, %v1331_v32  ;;  %vm1339_vm15 = vcmp.ge.f32.partialorder %v1331_v32, 0.0 }
 0x6a7   : > { %v1336_v37 = vadd.f32 %v1335_v7, %v1261_v40  ;;  %v1347_v10 = vsel %vm1339_vm15, %v1331_v32, %v1345_v41 }
 0x6a9   : > { %v1346_v60 = vmul.f32 %v1344_v38, %v1336_v37  ;;  %vm1340_vm0 = vcmp.ge.f32.partialorder %v1336_v37, 0.0 }
 0x6ab   : > { %v1348_v53 = vsel %vm1340_vm0, %v1336_v37, %v1346_v60 }
 0x6bd   : > { %v1893_v59 = vpop.f32.mrb[16].mxu0 }
 0x6be   : > { %v1894_v11 = vpop.f32.mrb[17].mxu0 }
 0x6bf   : > { %v1895_v42 = vadd.f32 %v1894_v11, %v1893_v59 }
 0x6c1   : > { %v1535_v43 = vadd.f32 %v1895_v42, %v1534_v27  ;;  %v1896_v44 = vpop.f32.mrb[18].mxu0 }
 0x6c2   : > { %v1897_v46 = vpop.f32.mrb[19].mxu0 }
 0x6c3   : > { %v1543_v48 = vadd.f32 %v1535_v43, %v1347_v10  ;;  %v1898_v36 = vadd.f32 %v1897_v46, %v1896_v44 }
 0x6c5   : > { %v1738_v51 = vmul.f32 -1.442695, %v1543_v48  ;;  %v1540_v52 = vadd.f32 %v1927_v26, %v1898_v36 }
 0x6c7   : > { %2305 = vpow2.f32 %v1738_v51  ;;  %v1544_v54 = vadd.f32 %v1540_v52, %v1348_v53 }
 0x6c9   : > { %v1739_v55 = vmul.f32 -1.442695, %v1544_v54 }
 0x6cb   : > { %2307 = vpow2.f32 %v1739_v55 }
 0x6d1   : > { %v2306_v56 = vpop.eup %2305 }
 0x6d2   : > { %v1551_v57 = vadd.f32 1.0, %v2306_v56 }
 0x6d4   : > { %2309 = vrcp.f32 %v1551_v57 }
 0x6d5   : > { %v2308_v58 = vpop.eup %2307 }
 0x6d6   : > { %v1552_v33 = vadd.f32 1.0, %v2308_v58 }
 0x6d8   : > { %2311 = vrcp.f32 %v1552_v33 }
 0x6de   : > { %v2310_v34 = vpop.eup %2309 }
 0x6df   : > { %vm1557_vm2 = vcmp.gt.f32.partialorder %v2315_v49, %v2310_v34 }
 0x6e0   : > { %v1559_v12 = vsel %vm1557_vm2, %v2315_v49, 0.0 }
 0x6e1   : > { %1561 = vst.msk [vmem:[%s244_s11] sm:$0xff] %vm307_vm1, %v1559_v12 }
 0x6e2   : > { %v2312_v45 = vpop.eup %2311 }
 0x6e3   : > { %vm1558_vm3 = vcmp.gt.f32.partialorder %v2316_v5, %v2312_v45 }
 0x6e4   : > { %v1560_v6 = vsel %vm1558_vm3, %v2316_v5, 0.0 }
 0x6e5   : > { %1562 = vst.msk [vmem:[%s244_s11 + $0x8] sm:$0xff] %vm307_vm1, %v1560_v6 }
 0x6e6   : > { %2330 = shalt.err (!%p2327_p3)
}
 0x6e7   : > { %s2331_s10 = scalar_lea.hbm %s3614_s29, 256  ;;  %s2335_s17 = scalar_lea.hbm %s3667_s6, 512 }
 0x6e8   : > { %p2332_p4 = scmp.ne.s32.totalorder %s3614_s29, %s2331_s10  ;;  %p2336_p9 = scmp.lt.u32.totalorder %s3614_s29, %s3667_s6 }
 0x6e9   : > { %p2337_p10 = scmp.lt.u32.totalorder %s2335_s17, %s2331_s10  ;;  %p2339_p12 = scmp.lt.u32.totalorder %s2331_s10, %s3614_s29 }
 0x6ea   : > { %p2333_p7 = pnand %p2332_p4, %p2459_p5 }
 0x6eb   : > { %p2338_p11 = por %p2337_p10, %p2336_p9 }
 0x6ec   : > { %p2334_p8 = pneg %p2333_p7 }
 0x6ed   : > { %p2340_p13 = por %p2339_p12, %p2338_p11 }
 0x6ef   : > { %p2341_p0 = pnand %p2340_p13, %p2334_p8 }
 0x6f1   : > { %2344 = shalt.err (!%p2341_p0)
}
 0x6f2   : > { %s2384_s11 = smov 128   ;;  %s2385_s26 = smov 8  }
 0x6f3   : > { %2252 = dma.vmem_to_hbm [thread:$0]  (%p2459_p5), %s3616_s20, 256, %s3614_s29, %s3620_s25, %s2384_s11, %s2384_s11, %s2385_s26  }
 0x6f4 PF: > { %p2258_p1 = scmp.ge.s32.totalorder %s2379_s24, 2  ;;  %s1592_s28 = sand.u32 1, %s2367_s21  }
 0x6f5   : > { %s1593_s9 = scalar_lea.sflag [#allocation3], %s1592_s28 }
 0x6f6   : > { %p2255_p2 = pnand %p2258_p1, %p2463_p6 }
 0x6f8   : > { %2362 = dma.done.wait (!%p2255_p2), %s1593_s9, 256  }
 0x6f9   : > { %2364 = vsyncadd (!%p2255_p2), %s1593_s9, 4294967040  ;;  %p16_p3 = scmp.ge.s32.totalorder %s2446_s27, 4   ;;  %s3672_s21 = smov %s2371_s22 }
 0x6fa   : > { %s3673_s22 = smov %s2375_s23  ;;  %s3674_s23 = smov %s2457_s30 }
 0x6fb   : > { %s3675_s24 = smov %s2446_s27  ;;  %18 = sbr.rel (!%p16_p3) target bundleno = 3 (0x3), region = 82 }
 0x702   :  { %1598 = vsyncpa [#allocation3], 1 }
 0x703   :  { %1600 = vsyncpa [#allocation3 + $0x1], 1 }

</bundles_post_ra>
